<compile_context>
chip_gen: v5e
topology: v5e:2x2
jax: 0.10.0
libtpu: 0.0.40
codegen_flags: <defaults>
</compile_context>

<pallas_src>
import functools

import jax
import jax.numpy as jnp
from jax.experimental import pallas as pl
from jax.experimental.pallas import tpu as pltpu

_LANES = 128
_SUBLANES = 8


def _round_up(a, b):
    return ((a + b - 1) // b) * b


def _silu_f32(x):
    # SiLU(x) = x * sigmoid(x) = x / (1 + exp(-x)).
    # exp -> EUP; approx reciprocal also stays on the EUP slot instead of a
    # VPU Newton divide. Elementwise math kept in f32 (v5e has no bf16 VPU/EUP).
    return x * pl.reciprocal(1.0 + jnp.exp(-x), approx=True)


def mlp_kernel(x_ref,
               w_in_ref, b_in_ref,
               w_h0_ref, b_h0_ref,
               w_h1_ref, b_h1_ref,
               w_out_ref, b_out_ref,
               o_ref):
    # bf16 operands feed the MXU; accumulation is f32 throughout.
    x = x_ref[...]                                                  # bf16

    # input_layer + SiLU
    h = _silu_f32(jnp.dot(x, w_in_ref[...],
                          preferred_element_type=jnp.float32) + b_in_ref[...])

    # hidden layer 0 with skip connection: h = act(W h + b) + h  (skip add f32)
    h = _silu_f32(jnp.dot(h.astype(jnp.bfloat16), w_h0_ref[...],
                          preferred_element_type=jnp.float32)
                  + b_h0_ref[...]) + h

    # hidden layer 1 with skip connection
    h = _silu_f32(jnp.dot(h.astype(jnp.bfloat16), w_h1_ref[...],
                          preferred_element_type=jnp.float32)
                  + b_h1_ref[...]) + h

    # output_layer (no activation); lane-padded to 128 -> unmasked full-lane vst
    logits = (jnp.dot(h.astype(jnp.bfloat16), w_out_ref[...],
                      preferred_element_type=jnp.float32) + b_out_ref[...])
    o_ref[...] = logits.astype(o_ref.dtype)


def prepare_params(params):
    """One-time parameter prep (call OUTSIDE the per-step forward):
       * pad w_in rows (D_in) and w_out/b_out columns (D_out) to 128 lanes,
       * cast matmul weights to bf16 (MXU-native), keep biases in f32."""
    D_in, H = params["w_in"].shape
    D_out = params["w_out"].shape[1]
    D_in_pad = _round_up(D_in, _LANES)
    D_out_pad = _round_up(D_out, _LANES)

    w_in = params["w_in"]
    if D_in_pad != D_in:
        w_in = jnp.pad(w_in, ((0, D_in_pad - D_in), (0, 0)))
    w_out, b_out = params["w_out"], params["b_out"]
    if D_out_pad != D_out:
        w_out = jnp.pad(w_out, ((0, 0), (0, D_out_pad - D_out)))
        b_out = jnp.pad(b_out, ((0, 0), (0, D_out_pad - D_out)))

    bf = jnp.bfloat16
    return dict(
        w_in=w_in.astype(bf), b_in=params["b_in"],
        w_h0=params["w_h0"].astype(bf), b_h0=params["b_h0"],
        w_h1=params["w_h1"].astype(bf), b_h1=params["b_h1"],
        w_out=w_out.astype(bf), b_out=b_out)


@functools.partial(jax.jit, static_argnames=("d_out", "block_m"))
def mlp_forward(x, prepared, *, d_out, block_m=256):
    """x: (B, D_in) float32. prepared: output of prepare_params()."""
    B, D_in = x.shape
    D_in_pad, H = prepared["w_in"].shape
    D_out_pad = prepared["w_out"].shape[1]

    # --- lane-dense input: bf16 + zero-pad features to D_in_pad ---
    x_p = x.astype(jnp.bfloat16)
    if D_in_pad != D_in:
        x_p = jnp.pad(x_p, ((0, 0), (0, D_in_pad - D_in)))

    # --- batch tiling: big tiles, but keep >=2 grid steps when possible so
    # both v7x TensorCores get work (harmless on single-TC v5e/v6e). ---
    B8 = _round_up(B, _SUBLANES)
    if B8 >= 2 * _SUBLANES:
        bm = min(block_m, _round_up(B8 // 2, _SUBLANES))
    else:
        bm = _SUBLANES
    B_pad = _round_up(B, bm)
    if B_pad != B:
        x_p = jnp.pad(x_p, ((0, B_pad - B), (0, 0)))
    grid = (B_pad // bm,)

    # Weights / biases use full-array blocks (grid-invariant -> fetched once,
    # ~0.4 MB bf16 at H=256). Only the batch axis of x / out is tiled.
    full = lambda shape: pl.BlockSpec(shape, lambda i: (0, 0))

    flops = 2 * B_pad * (D_in_pad * H + 2 * H * H + H * D_out_pad)
    transcendentals = 2 * 3 * B_pad * H          # exp + recip per SiLU element
    bytes_accessed = (
        2 * (B_pad * D_in_pad                            # bf16 x
             + D_in_pad * H + 2 * H * H + H * D_out_pad)  # bf16 weights
        + 4 * (3 * H + D_out_pad)                         # f32 biases
        + 4 * B_pad * D_out_pad)                          # f32 output

    out = pl.pallas_call(
        mlp_kernel,
        out_shape=jax.ShapeDtypeStruct((B_pad, D_out_pad), jnp.float32),
        grid_spec=pltpu.PrefetchScalarGridSpec(
            num_scalar_prefetch=0,
            grid=grid,
            in_specs=[
                pl.BlockSpec((bm, D_in_pad), lambda i: (i, 0)),    # x
                full((D_in_pad, H)), full((1, H)),                 # input_layer
                full((H, H)),        full((1, H)),                 # hidden 0
                full((H, H)),        full((1, H)),                 # hidden 1
                full((H, D_out_pad)), full((1, D_out_pad)),        # output_layer
            ],
            out_specs=pl.BlockSpec((bm, D_out_pad), lambda i: (i, 0)),
        ),
        compiler_params=pltpu.CompilerParams(
            dimension_semantics=("parallel",),
            vmem_limit_bytes=32 * 1024 * 1024),
        cost_estimate=pl.CostEstimate(
            flops=flops,
            transcendentals=transcendentals,
            bytes_accessed=bytes_accessed),
    )(x_p,
      prepared["w_in"], prepared["b_in"],
      prepared["w_h0"], prepared["b_h0"],
      prepared["w_h1"], prepared["b_h1"],
      prepared["w_out"], prepared["b_out"])

    # Strip batch padding and output-lane padding.
    return out[:B, :d_out]


def init_params(key, input_dim, output_dim, hidden_dim):
    """PyTorch-style Linear init: U(-1/sqrt(fan_in), 1/sqrt(fan_in))."""
    def linear(k, fan_in, fan_out):
        k_w, k_b = jax.random.split(k)
        bound = 1.0 / jnp.sqrt(jnp.float32(fan_in))
        # stored as (in, out) so the kernel computes x @ W
        w = jax.random.uniform(k_w, (fan_in, fan_out), jnp.float32, -bound, bound)
        b = jax.random.uniform(k_b, (1, fan_out), jnp.float32, -bound, bound)
        return w, b

    keys = jax.random.split(key, 4)
    w_in, b_in = linear(keys[0], input_dim, hidden_dim)
    w_h0, b_h0 = linear(keys[1], hidden_dim, hidden_dim)
    w_h1, b_h1 = linear(keys[2], hidden_dim, hidden_dim)
    w_out, b_out = linear(keys[3], hidden_dim, output_dim)
    return dict(w_in=w_in, b_in=b_in, w_h0=w_h0, b_h0=b_h0,
                w_h1=w_h1, b_h1=b_h1, w_out=w_out, b_out=b_out)


def mlp_reference(x, p):
    """Full-f32 reference (matches the PyTorch module semantics)."""
    h = jax.nn.silu(x @ p["w_in"] + p["b_in"])
    h = jax.nn.silu(h @ p["w_h0"] + p["b_h0"]) + h   # skip connection
    h = jax.nn.silu(h @ p["w_h1"] + p["b_h1"]) + h   # skip connection
    return h @ p["w_out"] + p["b_out"]


def mlp_reference_bf16(x, p):
    """Reference with the same bf16-operand / f32-accumulate matmul scheme."""
    bf, f32 = jnp.bfloat16, jnp.float32
    dot = lambda a, w: jnp.dot(a.astype(bf), w.astype(bf),
                               preferred_element_type=f32)
    h = jax.nn.silu(dot(x, p["w_in"]) + p["b_in"])
    h = jax.nn.silu(dot(h, p["w_h0"]) + p["b_h0"]) + h
    h = jax.nn.silu(dot(h, p["w_h1"]) + p["b_h1"]) + h
    return dot(h, p["w_out"]) + p["b_out"]


if __name__ == "__main__":
    # Shapes consistent with MLP(input_dim=16, output_dim=8, hidden_dim=256,
    # num_hiddens=2, hidden_dims=None -> skip connections).
    B, D_IN, HIDDEN, D_OUT = 256, 16, 256, 8

    key = jax.random.PRNGKey(0)
    k_x, k_p = jax.random.split(key)
    x = jax.random.normal(k_x, (B, D_IN), jnp.float32)
    params = init_params(k_p, D_IN, D_OUT, HIDDEN)
    prepared = prepare_params(params)          # one-time pad + bf16 cast

    out = jax.block_until_ready(mlp_forward(x, prepared, d_out=D_OUT))
    assert out.shape == (B, D_OUT)

    # Tight check vs. a reference that mirrors the bf16-matmul / f32-accum
    # scheme (remaining diff: approx EUP reciprocal in SiLU), plus a looser
    # sanity check vs. the full-f32 PyTorch-equivalent reference.
    ref_bf16 = mlp_reference_bf16(x, params)
    ref_f32 = mlp_reference(x, params)
    assert jnp.allclose(out, ref_bf16, atol=3e-2, rtol=3e-2)
    assert jnp.allclose(out, ref_f32, atol=1e-1, rtol=1e-1)

    # Exercise the batch-padding / small-batch path (bm drops to 16, grid=2).
    x_small = x[:20]
    out_small = jax.block_until_ready(mlp_forward(x_small, prepared, d_out=D_OUT))
    assert out_small.shape == (20, D_OUT)
    assert jnp.allclose(out_small, mlp_reference_bf16(x_small, params),
                        atol=3e-2, rtol=3e-2)

    print("KERNEL_OK")
</pallas_src>

<mosaic_0001>
module attributes {stable_mosaic.version = 11 : i64} {
  func.func @mlp_kernel(%arg0: i32, %arg1: memref<128x128xbf16, #tpu.memory_space<vmem>>, %arg2: memref<128x256xbf16, #tpu.memory_space<vmem>>, %arg3: memref<1x256xf32, #tpu.memory_space<vmem>>, %arg4: memref<256x256xbf16, #tpu.memory_space<vmem>>, %arg5: memref<1x256xf32, #tpu.memory_space<vmem>>, %arg6: memref<256x256xbf16, #tpu.memory_space<vmem>>, %arg7: memref<1x256xf32, #tpu.memory_space<vmem>>, %arg8: memref<256x128xbf16, #tpu.memory_space<vmem>>, %arg9: memref<1x128xf32, #tpu.memory_space<vmem>>, %arg10: memref<128x128xf32, #tpu.memory_space<vmem>>) attributes {dimension_semantics = [#tpu.dimension_semantics<parallel>], iteration_bounds = array<i64: 2>, scalar_prefetch = 0 : i64, scratch_operands = 0 : i64, tpu.core_type = #tpu.core_type<tc>, window_params = [{transform_indices = @transform_0, window_bounds = array<i64: 128, 128>}, {pipeline_mode = #tpu.pipeline_mode<synchronous>, transform_indices = @transform_1, window_bounds = array<i64: 128, 256>}, {pipeline_mode = #tpu.pipeline_mode<synchronous>, transform_indices = @transform_2, window_bounds = array<i64: 1, 256>}, {pipeline_mode = #tpu.pipeline_mode<synchronous>, transform_indices = @transform_3, window_bounds = array<i64: 256, 256>}, {pipeline_mode = #tpu.pipeline_mode<synchronous>, transform_indices = @transform_4, window_bounds = array<i64: 1, 256>}, {pipeline_mode = #tpu.pipeline_mode<synchronous>, transform_indices = @transform_5, window_bounds = array<i64: 256, 256>}, {pipeline_mode = #tpu.pipeline_mode<synchronous>, transform_indices = @transform_6, window_bounds = array<i64: 1, 256>}, {pipeline_mode = #tpu.pipeline_mode<synchronous>, transform_indices = @transform_7, window_bounds = array<i64: 256, 128>}, {pipeline_mode = #tpu.pipeline_mode<synchronous>, transform_indices = @transform_8, window_bounds = array<i64: 1, 128>}, {transform_indices = @transform_9, window_bounds = array<i64: 128, 128>}]} {
    %c0 = arith.constant 0 : index
    %c0_0 = arith.constant 0 : index
    %0 = vector.load %arg1[%c0, %c0_0] : memref<128x128xbf16, #tpu.memory_space<vmem>>, vector<128x128xbf16>
    %c0_1 = arith.constant 0 : index
    %c0_2 = arith.constant 0 : index
    %1 = vector.load %arg2[%c0_1, %c0_2] : memref<128x256xbf16, #tpu.memory_space<vmem>>, vector<128x256xbf16>
    %cst = arith.constant dense<0.000000e+00> : vector<128x256xf32>
    %2 = tpu.matmul %0, %1, %cst {dimension_numbers = #tpu.dot_dimension_numbers<[1], [0], [0], [1], [0, 0, 1, 1], [], []>} : vector<128x128xbf16>, vector<128x256xbf16>, vector<128x256xf32> -> vector<128x256xf32>
    %c0_3 = arith.constant 0 : index
    %c0_4 = arith.constant 0 : index
    %3 = vector.load %arg3[%c0_3, %c0_4] : memref<1x256xf32, #tpu.memory_space<vmem>>, vector<1x256xf32>
    %4 = vector.broadcast %3 : vector<1x256xf32> to vector<128x256xf32>
    %5 = arith.addf %2, %4 : vector<128x256xf32>
    %cst_5 = arith.constant 0.000000e+00 : f32
    %6 = vector.broadcast %cst_5 : f32 to vector<128x256xf32>
    %7 = arith.subf %6, %5 : vector<128x256xf32>
    %8 = math.exp %7 : vector<128x256xf32>
    %cst_6 = arith.constant 1.000000e+00 : f32
    %9 = vector.broadcast %cst_6 : f32 to vector<128x256xf32>
    %10 = arith.addf %9, %8 : vector<128x256xf32>
    %11 = tpu.reciprocal %10 {approx = true} : vector<128x256xf32> -> vector<128x256xf32>
    %12 = arith.mulf %5, %11 : vector<128x256xf32>
    %13 = arith.truncf %12 : vector<128x256xf32> to vector<128x256xbf16>
    %c0_7 = arith.constant 0 : index
    %c0_8 = arith.constant 0 : index
    %14 = vector.load %arg4[%c0_7, %c0_8] : memref<256x256xbf16, #tpu.memory_space<vmem>>, vector<256x256xbf16>
    %cst_9 = arith.constant dense<0.000000e+00> : vector<128x256xf32>
    %15 = tpu.matmul %13, %14, %cst_9 {dimension_numbers = #tpu.dot_dimension_numbers<[1], [0], [0], [1], [0, 0, 1, 1], [], []>} : vector<128x256xbf16>, vector<256x256xbf16>, vector<128x256xf32> -> vector<128x256xf32>
    %c0_10 = arith.constant 0 : index
    %c0_11 = arith.constant 0 : index
    %16 = vector.load %arg5[%c0_10, %c0_11] : memref<1x256xf32, #tpu.memory_space<vmem>>, vector<1x256xf32>
    %17 = vector.broadcast %16 : vector<1x256xf32> to vector<128x256xf32>
    %18 = arith.addf %15, %17 : vector<128x256xf32>
    %cst_12 = arith.constant 0.000000e+00 : f32
    %19 = vector.broadcast %cst_12 : f32 to vector<128x256xf32>
    %20 = arith.subf %19, %18 : vector<128x256xf32>
    %21 = math.exp %20 : vector<128x256xf32>
    %cst_13 = arith.constant 1.000000e+00 : f32
    %22 = vector.broadcast %cst_13 : f32 to vector<128x256xf32>
    %23 = arith.addf %22, %21 : vector<128x256xf32>
    %24 = tpu.reciprocal %23 {approx = true} : vector<128x256xf32> -> vector<128x256xf32>
    %25 = arith.mulf %18, %24 : vector<128x256xf32>
    %26 = arith.addf %25, %12 : vector<128x256xf32>
    %27 = arith.truncf %26 : vector<128x256xf32> to vector<128x256xbf16>
    %c0_14 = arith.constant 0 : index
    %c0_15 = arith.constant 0 : index
    %28 = vector.load %arg6[%c0_14, %c0_15] : memref<256x256xbf16, #tpu.memory_space<vmem>>, vector<256x256xbf16>
    %cst_16 = arith.constant dense<0.000000e+00> : vector<128x256xf32>
    %29 = tpu.matmul %27, %28, %cst_16 {dimension_numbers = #tpu.dot_dimension_numbers<[1], [0], [0], [1], [0, 0, 1, 1], [], []>} : vector<128x256xbf16>, vector<256x256xbf16>, vector<128x256xf32> -> vector<128x256xf32>
    %c0_17 = arith.constant 0 : index
    %c0_18 = arith.constant 0 : index
    %30 = vector.load %arg7[%c0_17, %c0_18] : memref<1x256xf32, #tpu.memory_space<vmem>>, vector<1x256xf32>
    %31 = vector.broadcast %30 : vector<1x256xf32> to vector<128x256xf32>
    %32 = arith.addf %29, %31 : vector<128x256xf32>
    %cst_19 = arith.constant 0.000000e+00 : f32
    %33 = vector.broadcast %cst_19 : f32 to vector<128x256xf32>
    %34 = arith.subf %33, %32 : vector<128x256xf32>
    %35 = math.exp %34 : vector<128x256xf32>
    %cst_20 = arith.constant 1.000000e+00 : f32
    %36 = vector.broadcast %cst_20 : f32 to vector<128x256xf32>
    %37 = arith.addf %36, %35 : vector<128x256xf32>
    %38 = tpu.reciprocal %37 {approx = true} : vector<128x256xf32> -> vector<128x256xf32>
    %39 = arith.mulf %32, %38 : vector<128x256xf32>
    %40 = arith.addf %39, %26 : vector<128x256xf32>
    %41 = arith.truncf %40 : vector<128x256xf32> to vector<128x256xbf16>
    %c0_21 = arith.constant 0 : index
    %c0_22 = arith.constant 0 : index
    %42 = vector.load %arg8[%c0_21, %c0_22] : memref<256x128xbf16, #tpu.memory_space<vmem>>, vector<256x128xbf16>
    %cst_23 = arith.constant dense<0.000000e+00> : vector<128x128xf32>
    %43 = tpu.matmul %41, %42, %cst_23 {dimension_numbers = #tpu.dot_dimension_numbers<[1], [0], [0], [1], [0, 0, 1, 1], [], []>} : vector<128x256xbf16>, vector<256x128xbf16>, vector<128x128xf32> -> vector<128x128xf32>
    %c0_24 = arith.constant 0 : index
    %c0_25 = arith.constant 0 : index
    %44 = vector.load %arg9[%c0_24, %c0_25] : memref<1x128xf32, #tpu.memory_space<vmem>>, vector<1x128xf32>
    %45 = vector.broadcast %44 : vector<1x128xf32> to vector<128x128xf32>
    %46 = arith.addf %43, %45 : vector<128x128xf32>
    %c0_26 = arith.constant 0 : index
    %c0_27 = arith.constant 0 : index
    %47 = vector.load %arg10[%c0_26, %c0_27] : memref<128x128xf32, #tpu.memory_space<vmem>>, vector<128x128xf32>
    tpu.vector_store %arg10[%c0_26, %c0_27], %46 {strides = array<i32>} : memref<128x128xf32, #tpu.memory_space<vmem>>, vector<128x128xf32>,
    return
  }
  func.func @transform_0(%arg0: i32) -> (i32, i32) {
    %c0_i32 = arith.constant 0 : i32
    %c0_i32_0 = arith.constant 0 : i32
    return %arg0, %c0_i32 : i32, i32
  }
  func.func @transform_1(%arg0: i32) -> (i32, i32) {
    %c0_i32 = arith.constant 0 : i32
    %c0_i32_0 = arith.constant 0 : i32
    %c0_i32_1 = arith.constant 0 : i32
    return %c0_i32, %c0_i32_0 : i32, i32
  }
  func.func @transform_2(%arg0: i32) -> (i32, i32) {
    %c0_i32 = arith.constant 0 : i32
    %c0_i32_0 = arith.constant 0 : i32
    %c0_i32_1 = arith.constant 0 : i32
    return %c0_i32, %c0_i32_0 : i32, i32
  }
  func.func @transform_3(%arg0: i32) -> (i32, i32) {
    %c0_i32 = arith.constant 0 : i32
    %c0_i32_0 = arith.constant 0 : i32
    %c0_i32_1 = arith.constant 0 : i32
    return %c0_i32, %c0_i32_0 : i32, i32
  }
  func.func @transform_4(%arg0: i32) -> (i32, i32) {
    %c0_i32 = arith.constant 0 : i32
    %c0_i32_0 = arith.constant 0 : i32
    %c0_i32_1 = arith.constant 0 : i32
    return %c0_i32, %c0_i32_0 : i32, i32
  }
  func.func @transform_5(%arg0: i32) -> (i32, i32) {
    %c0_i32 = arith.constant 0 : i32
    %c0_i32_0 = arith.constant 0 : i32
    %c0_i32_1 = arith.constant 0 : i32
    return %c0_i32, %c0_i32_0 : i32, i32
  }
  func.func @transform_6(%arg0: i32) -> (i32, i32) {
    %c0_i32 = arith.constant 0 : i32
    %c0_i32_0 = arith.constant 0 : i32
    %c0_i32_1 = arith.constant 0 : i32
    return %c0_i32, %c0_i32_0 : i32, i32
  }
  func.func @transform_7(%arg0: i32) -> (i32, i32) {
    %c0_i32 = arith.constant 0 : i32
    %c0_i32_0 = arith.constant 0 : i32
    %c0_i32_1 = arith.constant 0 : i32
    return %c0_i32, %c0_i32_0 : i32, i32
  }
  func.func @transform_8(%arg0: i32) -> (i32, i32) {
    %c0_i32 = arith.constant 0 : i32
    %c0_i32_0 = arith.constant 0 : i32
    %c0_i32_1 = arith.constant 0 : i32
    return %c0_i32, %c0_i32_0 : i32, i32
  }
  func.func @transform_9(%arg0: i32) -> (i32, i32) {
    %c0_i32 = arith.constant 0 : i32
    %c0_i32_0 = arith.constant 0 : i32
    return %arg0, %c0_i32 : i32, i32
  }
}

</mosaic_0001>

<bundles_post_ra>
// kernel: mlp_forward.1
= control target key start
LH: loop header
LB: loop body
LE: loop exit
PB: predicated region body
PF: predicated region fallthrough
CT: control target
= control target key end

     0   :  { %14 = vsyncpa [#allocation3], 0  ;;  %s4618_s0 = inlined_call_operand.vmem [shape: bf16[256,128], index: 0, kind: input, shape index: {}]   ;;  %s4619_s1 = inlined_call_operand.vmem [shape: bf16[128,256], index: 1, kind: input, shape index: {}]   ;;  %s4620_s2 = inlined_call_operand.vmem [shape: f32[1,256], index: 2, kind: input, shape index: {}]   ;;  %s4621_s3 = inlined_call_operand.vmem [shape: bf16[256,256], index: 3, kind: input, shape index: {}]   ;;  %s4622_s4 = inlined_call_operand.vmem [shape: f32[1,256], index: 4, kind: input, shape index: {}]   ;;  %s4623_s5 = inlined_call_operand.hbm [shape: bf16[256,256], index: 5, kind: input, shape index: {}]   ;;  %s4624_s6 = inlined_call_operand.vmem [shape: f32[1,256], index: 6, kind: input, shape index: {}]   ;;  %s4625_s7 = inlined_call_operand.hbm [shape: bf16[256,128], index: 7, kind: input, shape index: {}]   ;;  %s4626_s8 = inlined_call_operand.vmem [shape: f32[1,128], index: 8, kind: input, shape index: {}]   ;;  %s4627_s9 = inlined_call_operand.vmem [shape: f32[256,128], index: 9, kind: output, shape index: {}]  }
   0x1   :  { %15 = vsyncpa [#allocation5], 0  ;;  %s3519_s30 = smov 0  }
   0x2 LB: > { %s269_s12 = sshll.u32 %s4623_s5, 4  ;;  %s2434_s13 = sadd.s32 4294967295, %s3461_s30   ;;  %s3461_s30 = sphi %s3519_s30, %s21_s30   ;;  %s270_s12 = int_to_ptr.hbm [resolvable:$true] %s269_s12 }
   0x3   : > { %p2436_p0 = scmp.ge.s32.totalorder %s3461_s30, 1  ;;  %p246_p1 = scmp.lt.s32.totalorder %s3461_s30, 3 }
   0x4   : > { %p3532_p2 = scmp.eq.s32.totalorder %s2434_s13, 0  ;;  %s3463_s16 = smov [#allocation2]  }
   0x5   : > { %p3536_p3 = pnand %p2436_p0, %p246_p1  ;;  %s271_s17 = sshll.u32 %s3463_s16, 4  ;;  %s272_s17 = int_to_ptr.vmem [resolvable:$true] %s271_s17 }
   0x6   : > { %s286_s20 = sshll.u32 %s4625_s7, 4  ;;  %s3464_s21 = smov [#allocation4]   ;;  %s287_s20 = int_to_ptr.hbm [resolvable:$true] %s286_s20 }
   0x7   : > { %p2977_p4 = pneg %p3536_p3  ;;  %s288_s22 = sshll.u32 %s3464_s21, 4  ;;  %s289_s22 = int_to_ptr.vmem [resolvable:$true] %s288_s22 }
   0x8   : > { %s3465_s23 = smov 128   ;;  %s3466_s24 = smov 8  }
   0x9   : > { %p2978_p5 = pnand %p3532_p2, %p2977_p4  ;;  %s3467_s25 = smov 64  }
   0xa   : > { %s3468_s26 = smov 4   ;;  %316 = sbr.rel (%p3536_p3) target bundleno = 810 (0x32a), region = 56 }
   0xb   : > { %2980 = dma.hbm_to_vmem [thread:$0]  (!%p2978_p5), %s270_s12, 4096, %s272_s17, [#allocation3], %s3465_s23, %s3465_s23, %s3466_s24  }
   0xc   : > { %2983 = dma.hbm_to_vmem [thread:$0]  (!%p2978_p5), %s287_s20, 2048, %s289_s22, [#allocation5], %s3467_s25, %s3467_s25, %s3468_s26  }
   0xf   : > { %3452 = dma.done.wait (%p3532_p2), [#allocation3], 4096  }
  0x10   : > { %3454 = vsyncadd (%p3532_p2), [#allocation3], 4294963200 }
  0x11   : > { %3456 = dma.done.wait (%p3532_p2), [#allocation5], 2048  }
  0x12   : > { %3458 = vsyncadd (%p3532_p2), [#allocation5], 4294965248  ;;  %v2537_v0 = vld [vmem:[%s4619_s1 + $0x70] sm:$0xf]  ;;  %v2888_v1 = vld [vmem:[%s4619_s1 + $0x74] sm:$0xf0] }
  0x13   : > { %v2887_v2 = vld [vmem:[%s4619_s1 + $0x74] sm:$0xf]  ;;  %v2538_v3 = vor.u32 %v2888_v1, %v2537_v0  ;;  %v2539_v4 = vld [vmem:[%s4619_s1 + $0x78] sm:$0xf0]  ;;  %v2529_v5 = vld [vmem:[%s4619_s1 + $0x60] sm:$0xf] }
  0x14   : > { %v2886_v6 = vld [vmem:[%s4619_s1 + $0x64] sm:$0xf0]  ;;  %v2542_v7 = vor.u32 %v2887_v2, %v2539_v4  ;;  %v2885_v8 = vld [vmem:[%s4619_s1 + $0x64] sm:$0xf]  ;;  %v2531_v9 = vld [vmem:[%s4619_s1 + $0x68] sm:$0xf0] }
  0x15   : > { %536 = vmatpush.bf16.msra.mxu0 %v2538_v3  ;;  %v2530_v10 = vor.u32 %v2886_v6, %v2529_v5  ;;  %v2534_v11 = vor.u32 %v2885_v8, %v2531_v9  ;;  %v2521_v12 = vld [vmem:[%s4619_s1 + $0x50] sm:$0xf]  ;;  %v2884_v13 = vld [vmem:[%s4619_s1 + $0x54] sm:$0xf0]  ;;  %v2883_v14 = vld [vmem:[%s4619_s1 + $0x54] sm:$0xf] }
  0x16   : > { %585 = vmatpush.bf16.msra.mxu1 %v2542_v7  ;;  %v2523_v15 = vld [vmem:[%s4619_s1 + $0x58] sm:$0xf0]  ;;  %v2522_v16 = vor.u32 %v2884_v13, %v2521_v12  ;;  %v2513_v18 = vld [vmem:[%s4619_s1 + $0x40] sm:$0xf]  ;;  %v2882_v19 = vld [vmem:[%s4619_s1 + $0x44] sm:$0xf0] }
  0x17   : > { %v2526_v17 = vor.u32 %v2883_v14, %v2523_v15  ;;  %v2881_v20 = vld [vmem:[%s4619_s1 + $0x44] sm:$0xf]  ;;  %v2515_v21 = vld [vmem:[%s4619_s1 + $0x48] sm:$0xf0]  ;;  %v2514_v22 = vor.u32 %v2882_v19, %v2513_v18  ;;  %v2505_v24 = vld [vmem:[%s4619_s1 + $0x30] sm:$0xf] }
  0x18   : > { %v2518_v23 = vor.u32 %v2881_v20, %v2515_v21  ;;  %v2880_v25 = vld [vmem:[%s4619_s1 + $0x34] sm:$0xf0]  ;;  %v2879_v26 = vld [vmem:[%s4619_s1 + $0x34] sm:$0xf]  ;;  %v2507_v27 = vld [vmem:[%s4619_s1 + $0x38] sm:$0xf0] }
  0x19   : > { %537 = vmatpush.bf16.msra.mxu0 %v2530_v10  ;;  %s2443_s29 = sshll.u32 %s2434_s13, 4  ;;  %v2506_v28 = vor.u32 %v2880_v25, %v2505_v24  ;;  %v2510_v29 = vor.u32 %v2879_v26, %v2507_v27  ;;  %v2497_v30 = vld [vmem:[%s4619_s1 + $0x20] sm:$0xf]  ;;  %v2878_v31 = vld [vmem:[%s4619_s1 + $0x24] sm:$0xf0] }
  0x1a   : > { %586 = vmatpush.bf16.msra.mxu1 %v2534_v11  ;;  %p359_p6 = scmp.lt.s32.totalorder %s2443_s29, 31  ;;  %v2877_v32 = vld [vmem:[%s4619_s1 + $0x24] sm:$0xf]  ;;  %v2499_v33 = vld [vmem:[%s4619_s1 + $0x28] sm:$0xf0]  ;;  %v2498_v34 = vor.u32 %v2878_v31, %v2497_v30 }
  0x1b   : > { %v2502_v35 = vor.u32 %v2877_v32, %v2499_v33  ;;  %v2489_v36 = vld [vmem:[%s4619_s1 + $0x10] sm:$0xf]  ;;  %v2876_v37 = vld [vmem:[%s4619_s1 + $0x14] sm:$0xf0]  ;;  %v2875_v38 = vld [vmem:[%s4619_s1 + $0x14] sm:$0xf] }
  0x1c   : > { %s4631_s29 = smov (!%p359_p6, %s2443_s29), 31  ;;  %v2491_v39 = vld [vmem:[%s4619_s1 + $0x18] sm:$0xf0]  ;;  %v2490_v40 = vor.u32 %v2876_v37, %v2489_v36  ;;  %v2481_v42 = vld [vmem:[%s4619_s1] sm:$0xf] }
  0x1d   : > { %538 = vmatpush.bf16.msra.mxu0 %v2522_v16  ;;  %v2494_v41 = vor.u32 %v2875_v38, %v2491_v39  ;;  %v2874_v43 = vld [vmem:[%s4619_s1 + $0x4] sm:$0xf0]  ;;  %s2444_s11 = sshll.u32 %s4631_s29, 2  ;;  %v2873_v44 = vld [vmem:[%s4619_s1 + $0x4] sm:$0xf]  ;;  %s2446_s26 = sshll.u32 %s4631_s29, 3 }
  0x1e   : > { %587 = vmatpush.bf16.msra.mxu1 %v2526_v17  ;;  %v2483_v45 = vld [vmem:[%s4619_s1 + $0x8] sm:$0xf0]  ;;  %v2482_v46 = vor.u32 %v2874_v43, %v2481_v42  ;;  %s3661_s13 = scalar_lea.vmem %s4618_s0, %s2444_s11  ;;  %v2903_v49 = vld [vmem:[%s4621_s3 + $0x74] sm:$0xf]  ;;  %v2603_v50 = vld [vmem:[%s4621_s3 + $0x78] sm:$0xf0]  ;;  %s4582_s28 = scalar_lea.vmem %s4627_s9, %s2446_s26 }
  0x1f   : > { %v2486_v47 = vor.u32 %v2873_v44, %v2483_v45  ;;  %v2865_v48 = vld [vmem:[%s3661_s13] sm:$0xff]  ;;  %v2919_v51 = vld [vmem:[%s4621_s3 + $0xf4] sm:$0xf]  ;;  %v2606_v52 = vor.u32 %v2903_v49, %v2603_v50  ;;  %v2667_v53 = vld [vmem:[%s4621_s3 + $0xf8] sm:$0xf0] }
  0x20   : > { %v2670_v54 = vor.u32 %v2919_v51, %v2667_v53  ;;  %v2866_v55 = vld [vmem:[%s3661_s13 + $0x8] sm:$0xff]  ;;  %v2901_v56 = vld [vmem:[%s4621_s3 + $0x64] sm:$0xf]  ;;  %v2867_v62 = vld [vmem:[%s3661_s13 + $0x10] sm:$0xff] }
  0x21   : > { %539 = vmatpush.bf16.msra.mxu0 %v2514_v22  ;;  %v2595_v57 = vld [vmem:[%s4621_s3 + $0x68] sm:$0xf0]  ;;  %v2917_v58 = vld [vmem:[%s4621_s3 + $0xe4] sm:$0xf]  ;;  %v2899_v63 = vld [vmem:[%s4621_s3 + $0x54] sm:$0xf] }
  0x22   : > { %588 = vmatpush.bf16.msra.mxu1 %v2518_v23  ;;  %v2598_v59 = vor.u32 %v2901_v56, %v2595_v57  ;;  %v2659_v60 = vld [vmem:[%s4621_s3 + $0xe8] sm:$0xf0]  ;;  %v2587_v0 = vld [vmem:[%s4621_s3 + $0x58] sm:$0xf0]  ;;  %v2915_v1 = vld [vmem:[%s4621_s3 + $0xd4] sm:$0xf] }
  0x23   : > { %v2662_v61 = vor.u32 %v2917_v58, %v2659_v60  ;;  %v2590_v2 = vor.u32 %v2899_v63, %v2587_v0  ;;  %v2651_v3 = vld [vmem:[%s4621_s3 + $0xd8] sm:$0xf0]  ;;  %v2897_v6 = vld [vmem:[%s4621_s3 + $0x44] sm:$0xf]  ;;  %v2579_v7 = vld [vmem:[%s4621_s3 + $0x48] sm:$0xf0] }
  0x24   : > { %v2654_v4 = vor.u32 %v2915_v1, %v2651_v3  ;;  %v2868_v5 = vld [vmem:[%s3661_s13 + $0x18] sm:$0xff]  ;;  %v2913_v8 = vld [vmem:[%s4621_s3 + $0xc4] sm:$0xf]  ;;  %v2582_v9 = vor.u32 %v2897_v6, %v2579_v7  ;;  %v2643_v10 = vld [vmem:[%s4621_s3 + $0xc8] sm:$0xf0] }
  0x25   : > { %540 = vmatpush.bf16.msra.mxu0 %v2506_v28  ;;  %v2646_v11 = vor.u32 %v2913_v8, %v2643_v10  ;;  %v2869_v12 = vld [vmem:[%s3661_s13 + $0x20] sm:$0xff]  ;;  %v2895_v13 = vld [vmem:[%s4621_s3 + $0x34] sm:$0xf]  ;;  %v2571_v14 = vld [vmem:[%s4621_s3 + $0x38] sm:$0xf0] }
  0x26   : > { %589 = vmatpush.bf16.msra.mxu1 %v2510_v29  ;;  %v2911_v15 = vld [vmem:[%s4621_s3 + $0xb4] sm:$0xf]  ;;  %v2574_v16 = vor.u32 %v2895_v13, %v2571_v14  ;;  %v2635_v17 = vld [vmem:[%s4621_s3 + $0xb8] sm:$0xf0]  ;;  %v2870_v19 = vld [vmem:[%s3661_s13 + $0x28] sm:$0xff] }
  0x27   : > { %v2638_v18 = vor.u32 %v2911_v15, %v2635_v17  ;;  %v2893_v20 = vld [vmem:[%s4621_s3 + $0x24] sm:$0xf]  ;;  %v2563_v21 = vld [vmem:[%s4621_s3 + $0x28] sm:$0xf0]  ;;  %v2871_v26 = vld [vmem:[%s3661_s13 + $0x30] sm:$0xff] }
  0x28   : > { %v2909_v22 = vld [vmem:[%s4621_s3 + $0xa4] sm:$0xf]  ;;  %v2566_v23 = vor.u32 %v2893_v20, %v2563_v21  ;;  %v2627_v24 = vld [vmem:[%s4621_s3 + $0xa8] sm:$0xf0]  ;;  %v2601_v27 = vld [vmem:[%s4621_s3 + $0x70] sm:$0xf] }
  0x29   : > { %541 = vmatpush.bf16.msra.mxu0 %v2498_v34  ;;  %v2630_v25 = vor.u32 %v2909_v22, %v2627_v24  ;;  %v2904_v28 = vld [vmem:[%s4621_s3 + $0x74] sm:$0xf0]  ;;  %v2665_v29 = vld [vmem:[%s4621_s3 + $0xf0] sm:$0xf]  ;;  %v2593_v33 = vld [vmem:[%s4621_s3 + $0x60] sm:$0xf] }
  0x2a   : > { %590 = vmatpush.bf16.msra.mxu1 %v2502_v35  ;;  %v2602_v30 = vor.u32 %v2904_v28, %v2601_v27  ;;  %v2920_v31 = vld [vmem:[%s4621_s3 + $0xf4] sm:$0xf0]  ;;  %v2902_v34 = vld [vmem:[%s4621_s3 + $0x64] sm:$0xf0]  ;;  %v2657_v35 = vld [vmem:[%s4621_s3 + $0xe0] sm:$0xf] }
  0x2b   : > { %v2666_v32 = vor.u32 %v2920_v31, %v2665_v29  ;;  %v2594_v36 = vor.u32 %v2902_v34, %v2593_v33  ;;  %v2918_v37 = vld [vmem:[%s4621_s3 + $0xe4] sm:$0xf0]  ;;  %v2585_v39 = vld [vmem:[%s4621_s3 + $0x50] sm:$0xf]  ;;  %v2916_v43 = vld [vmem:[%s4621_s3 + $0xd4] sm:$0xf0] }
  0x2c   : > { %1040 = vmatpush.bf16.msra.mxu2 %v2602_v30  ;;  %v2658_v38 = vor.u32 %v2918_v37, %v2657_v35  ;;  %v2872_v45 = vld [vmem:[%s3661_s13 + $0x38] sm:$0xff]  ;;  %v2914_v50 = vld [vmem:[%s4621_s3 + $0xc4] sm:$0xf0]  ;;  %v2561_v58 = vld [vmem:[%s4621_s3 + $0x20] sm:$0xf] }
  0x2d   : > { %542 = vmatpush.bf16.msra.mxu0 %v2490_v40  ;;  %1089 = vmatpush.bf16.msra.mxu3 %v2666_v32  ;;  %v2900_v40 = vld [vmem:[%s4621_s3 + $0x54] sm:$0xf0]  ;;  %v2625_v60 = vld [vmem:[%s4621_s3 + $0xa0] sm:$0xf]  ;;  %v2891_v1 = vld [vmem:[%s4621_s3 + $0x14] sm:$0xf] }
  0x2e   : > { %591 = vmatpush.bf16.msra.mxu1 %v2494_v41  ;;  %v2649_v41 = vld [vmem:[%s4621_s3 + $0xd0] sm:$0xf]  ;;  %v2586_v42 = vor.u32 %v2900_v40, %v2585_v39  ;;  %v2896_v53 = vld [vmem:[%s4621_s3 + $0x34] sm:$0xf0]  ;;  %v402_v63 = vld [vmem:[%s4620_s2] sm:$0x3] }
  0x2f   : > { %v2650_v44 = vor.u32 %v2916_v43, %v2649_v41  ;;  %v2912_v56 = vld [vmem:[%s4621_s3 + $0xb4] sm:$0xf0]  ;;  %v2907_v3 = vld [vmem:[%s4621_s3 + $0x94] sm:$0xf]  ;;  %v2553_v6 = vld [vmem:[%s4621_s3 + $0x10] sm:$0xf] }
  0x30   : > { %1041 = vmatpush.bf16.msra.mxu2 %v2594_v36  ;;  %v2892_v7 = vld [vmem:[%s4621_s3 + $0x14] sm:$0xf0]  ;;  %v3836_v8 = vperm.slane %v402_v63, 0  ;;  %v3844_v13 = vperm.slane %v402_v63, 1  ;;  %v2547_v17 = vld [vmem:[%s4621_s3 + $0x8] sm:$0xf0] }
  0x31   : > { %543 = vmatpush.bf16.msra.mxu0 %v2482_v46  ;;  %1090 = vmatpush.bf16.msra.mxu3 %v2658_v38  ;;  %v2577_v46 = vld [vmem:[%s4621_s3 + $0x40] sm:$0xf]  ;;  %v2554_v10 = vor.u32 %v2892_v7, %v2553_v6  ;;  %v2611_v22 = vld [vmem:[%s4621_s3 + $0x88] sm:$0xf0]  ;;  %v2890_v24 = vld [vmem:[%s4621_s3 + $0x4] sm:$0xf0] }
  0x32   : > { %592 = vmatpush.bf16.msra.mxu1 %v2486_v47  ;;  %v2898_v47 = vld [vmem:[%s4621_s3 + $0x44] sm:$0xf0]  ;;  %v2609_v28 = vld [vmem:[%s4621_s3 + $0x80] sm:$0xf] }
  0x33   : > { %v2578_v49 = vor.u32 %v2898_v47, %v2577_v46  ;;  %v2906_v29 = vld [vmem:[%s4621_s3 + $0x84] sm:$0xf0] }
  0x34   : > { %544 = vmatmul.bf16.vlgmr.msra.gmra.mxu0 %v2865_v48  ;;  %1042 = vmatpush.bf16.msra.mxu2 %v2586_v42  ;;  %v2610_v31 = vor.u32 %v2906_v29, %v2609_v28 }
  0x35   : > { %593 = vmatmul.bf16.vlgmr.msra.gmra.mxu1 %v2865_v48  ;;  %1138 = vmatpush.bf16.msrb.mxu0 %v2606_v52  ;;  %v2641_v48 = vld [vmem:[%s4621_s3 + $0xc0] sm:$0xf]  ;;  %v2569_v52 = vld [vmem:[%s4621_s3 + $0x30] sm:$0xf] }
  0x36   : > { %1187 = vmatpush.bf16.msrb.mxu1 %v2670_v54  ;;  %1091 = vmatpush.bf16.msra.mxu3 %v2650_v44  ;;  %v2642_v51 = vor.u32 %v2914_v50, %v2641_v48  ;;  %v2633_v54 = vld [vmem:[%s4621_s3 + $0xb0] sm:$0xf] }
  0x37   : > { %v2634_v57 = vor.u32 %v2912_v56, %v2633_v54 }
  0x38   : > { %1043 = vmatpush.bf16.msra.mxu2 %v2578_v49 }
  0x39   : > { %1139 = vmatpush.bf16.msrb.mxu0 %v2598_v59  ;;  %v2894_v59 = vld [vmem:[%s4621_s3 + $0x24] sm:$0xf0] }
  0x3a   : > { %1188 = vmatpush.bf16.msrb.mxu1 %v2662_v61  ;;  %1092 = vmatpush.bf16.msra.mxu3 %v2642_v51  ;;  %v2562_v61 = vor.u32 %v2894_v59, %v2561_v58 }
  0x3d   : > { %1140 = vmatpush.bf16.msrb.mxu0 %v2590_v2  ;;  %v2555_v2 = vld [vmem:[%s4621_s3 + $0x18] sm:$0xf0] }
  0x3e   : > { %1189 = vmatpush.bf16.msrb.mxu1 %v2654_v4  ;;  %1093 = vmatpush.bf16.msra.mxu3 %v2634_v57  ;;  %v2558_v4 = vor.u32 %v2891_v1, %v2555_v2 }
  0x41   : > { %1141 = vmatpush.bf16.msrb.mxu0 %v2582_v9 }
  0x42   : > { %1190 = vmatpush.bf16.msrb.mxu1 %v2646_v11  ;;  %v2617_v11 = vld [vmem:[%s4621_s3 + $0x90] sm:$0xf] }
  0x44   : > { %549 = vmatmul.bf16.gmra.mxu0 %v2866_v55 }
  0x45   : > { %598 = vmatmul.bf16.gmra.mxu1 %v2866_v55  ;;  %1142 = vmatpush.bf16.msrb.mxu0 %v2574_v16  ;;  %v2570_v55 = vor.u32 %v2896_v53, %v2569_v52  ;;  %v2889_v16 = vld [vmem:[%s4621_s3 + $0x4] sm:$0xf] }
  0x46   : > { %1191 = vmatpush.bf16.msrb.mxu1 %v2638_v18  ;;  %v2905_v18 = vld [vmem:[%s4621_s3 + $0x84] sm:$0xf]  ;;  %v2550_v21 = vor.u32 %v2889_v16, %v2547_v17 }
  0x47   : > { %1044 = vmatpush.bf16.msra.mxu2 %v2570_v55 }
  0x49   : > { %1143 = vmatpush.bf16.msrb.mxu0 %v2566_v23  ;;  %v2545_v23 = vld [vmem:[%s4621_s3] sm:$0xf] }
  0x4a   : > { %1192 = vmatpush.bf16.msrb.mxu1 %v2630_v25  ;;  %v2546_v27 = vor.u32 %v2890_v24, %v2545_v23 }
  0x4b   : > { %1045 = vmatpush.bf16.msra.mxu2 %v2562_v61 }
  0x4d   : > { %1144 = vmatpush.bf16.msrb.mxu0 %v2558_v4 }
  0x4f   : > { %1046 = vmatpush.bf16.msra.mxu2 %v2554_v10 }
  0x51   : > { %1145 = vmatpush.bf16.msrb.mxu0 %v2550_v21 }
  0x53   : > { %1047 = vmatpush.bf16.msra.mxu2 %v2546_v27 }
  0x54   : > { %554 = vmatmul.bf16.gmra.mxu0 %v2867_v62 }
  0x55   : > { %603 = vmatmul.bf16.gmra.mxu1 %v2867_v62  ;;  %v2910_v62 = vld [vmem:[%s4621_s3 + $0xa4] sm:$0xf0] }
  0x56   : > { %v2626_v0 = vor.u32 %v2910_v62, %v2625_v60 }
  0x58   : > { %1094 = vmatpush.bf16.msra.mxu3 %v2626_v0 }
  0x64   : > { %559 = vmatmul.bf16.gmra.mxu0 %v2868_v5 }
  0x65   : > { %608 = vmatmul.bf16.gmra.mxu1 %v2868_v5  ;;  %v2619_v5 = vld [vmem:[%s4621_s3 + $0x98] sm:$0xf0] }
  0x66   : > { %v2622_v9 = vor.u32 %v2907_v3, %v2619_v5 }
  0x68   : > { %1193 = vmatpush.bf16.msrb.mxu1 %v2622_v9 }
  0x74   : > { %564 = vmatmul.bf16.gmra.mxu0 %v2869_v12 }
  0x75   : > { %613 = vmatmul.bf16.gmra.mxu1 %v2869_v12  ;;  %v2908_v12 = vld [vmem:[%s4621_s3 + $0x94] sm:$0xf0] }
  0x76   : > { %v2618_v14 = vor.u32 %v2908_v12, %v2617_v11 }
  0x78   : > { %1095 = vmatpush.bf16.msra.mxu3 %v2618_v14 }
  0x7c   : > { %1096 = vmatpush.bf16.msra.mxu3 %v2610_v31 }
  0x84   : > { %569 = vmatmul.bf16.gmra.mxu0 %v2870_v19 }
  0x85   : > { %618 = vmatmul.bf16.gmra.mxu1 %v2870_v19 }
  0x94   : > { %574 = vmatmul.bf16.gmra.mxu0 %v2871_v26 }
  0x95   : > { %623 = vmatmul.bf16.gmra.mxu1 %v2871_v26  ;;  %v2614_v26 = vor.u32 %v2905_v18, %v2611_v22 }
  0x97   : > { %1194 = vmatpush.bf16.msrb.mxu1 %v2614_v26 }
  0xa4   : > { %579 = vmatmul.bf16.gmra.mxu0 %v2872_v45 }
  0xa5   : > { %628 = vmatmul.bf16.gmra.mxu1 %v2872_v45 }
  0xb1   : > { %v545_v15 = vpop.f32.mrf.mxu0 }
  0xb2   : > { %v3856_v19 = vadd.f32 %v545_v15, %v3836_v8  ;;  %v594_v20 = vpop.f32.mrf.mxu1 }
  0xb3   : > { %v3868_v25 = vadd.f32 %v594_v20, %v3844_v13 }
  0xb4   : > { %v634_v30 = vsub.f32 0.0, %v3856_v19 }
  0xb5   : > { %v635_v32 = vsub.f32 0.0, %v3868_v25 }
  0xb6   : > { %v666_v33 = vmul.f32 1.442695, %v634_v30 }
  0xb7   : > { %v668_v34 = vmul.f32 1.442695, %v635_v32 }
  0xb8   : > { %3003 = vpow2.f32 %v666_v33 }
  0xb9   : > { %v547_v35 = vpop.f32.mrf.mxu0  ;;  %3005 = vpow2.f32 %v668_v34 }
  0xba   : > { %v548_v36 = vadd.f32 %v547_v35, %v3836_v8  ;;  %v596_v37 = vpop.f32.mrf.mxu1 }
  0xbb   : > { %v597_v38 = vadd.f32 %v596_v37, %v3844_v13 }
  0xbc   : > { %v636_v39 = vsub.f32 0.0, %v548_v36 }
  0xbd   : > { %v637_v40 = vsub.f32 0.0, %v597_v38 }
  0xbe   : > { %v670_v41 = vmul.f32 1.442695, %v636_v39  ;;  %v3004_v42 = vpop.eup %3003 }
  0xbf   : > { %v672_v43 = vmul.f32 1.442695, %v637_v40  ;;  %v3006_v44 = vpop.eup %3005  ;;  %v730_v46 = vadd.f32 1.0, %v3004_v42 }
  0xc0   : > { %3007 = vpow2.f32 %v670_v41  ;;  %v731_v49 = vadd.f32 1.0, %v3006_v44 }
  0xc1   : > { %v550_v45 = vpop.f32.mrf.mxu0  ;;  %3009 = vpow2.f32 %v672_v43 }
  0xc2   : > { %v3881_v47 = vadd.f32 %v550_v45, %v3836_v8  ;;  %v599_v48 = vpop.f32.mrf.mxu1  ;;  %3011 = vrcp.f32 %v730_v46 }
  0xc3   : > { %v3884_v50 = vadd.f32 %v599_v48, %v3844_v13  ;;  %3013 = vrcp.f32 %v731_v49 }
  0xc4   : > { %v638_v51 = vsub.f32 0.0, %v3881_v47 }
  0xc5   : > { %v639_v52 = vsub.f32 0.0, %v3884_v50 }
  0xc6   : > { %v3008_v53 = vpop.eup %3007  ;;  %v674_v54 = vmul.f32 1.442695, %v638_v51 }
  0xc7   : > { %v732_v55 = vadd.f32 1.0, %v3008_v53  ;;  %v676_v56 = vmul.f32 1.442695, %v639_v52  ;;  %v3010_v57 = vpop.eup %3009 }
  0xc8   : > { %3015 = vpow2.f32 %v674_v54  ;;  %v733_v59 = vadd.f32 1.0, %v3010_v57  ;;  %v3012_v63 = vpop.eup %3011 }
  0xc9   : > { %3017 = vrcp.f32 %v732_v55  ;;  %v552_v58 = vpop.f32.mrf.mxu0  ;;  %v3014_v1 = vpop.eup %3013  ;;  %v3894_v9 = vmul.f32 %v3012_v63, %v3856_v19 }
  0xca   : > { %3019 = vpow2.f32 %v676_v56  ;;  %v553_v60 = vadd.f32 %v552_v58, %v3836_v8  ;;  %v601_v61 = vpop.f32.mrf.mxu1  ;;  %v3904_v18 = vmul.f32 %v3014_v1, %v3868_v25 }
  0xcb   : > { %v3890_v62 = vadd.f32 %v601_v61, %v3844_v13  ;;  %3021 = vrcp.f32 %v733_v59 }
  0xcc   : > { %v640_v0 = vsub.f32 0.0, %v553_v60 }
  0xcd   : > { %v641_v2 = vsub.f32 0.0, %v3890_v62 }
  0xce   : > { %v3016_v3 = vpop.eup %3015  ;;  %v678_v4 = vmul.f32 1.442695, %v640_v0 }
  0xcf   : > { %v3018_v5 = vpop.eup %3017  ;;  %v680_v6 = vmul.f32 1.442695, %v641_v2  ;;  %v734_v14 = vadd.f32 1.0, %v3016_v3 }
  0xd0   : > { %v3020_v7 = vpop.eup %3019  ;;  %3023 = vpow2.f32 %v678_v4  ;;  %v3896_v10 = vmul.f32 %v3018_v5, %v548_v36  ;;  %v2729_v5 = vld [vmem:[#allocation2 + $0x70] sm:$0xf] }
  0xd1   : > { %v555_v11 = vpop.f32.mrf.mxu0  ;;  %v3022_v12 = vpop.eup %3021  ;;  %3025 = vpow2.f32 %v680_v6  ;;  %v735_v20 = vadd.f32 1.0, %v3020_v7  ;;  %v2936_v6 = vld [vmem:[#allocation2 + $0x74] sm:$0xf0]  ;;  %v2793_v7 = vld [vmem:[#allocation2 + $0xf0] sm:$0xf] }
  0xd2   : > { %v3899_v15 = vadd.f32 %v555_v11, %v3836_v8  ;;  %v604_v16 = vpop.f32.mrf.mxu1  ;;  %v826_v17 = vpack.c.bf16 %v3896_v10, %v3894_v9  ;;  %v3909_v21 = vmul.f32 %v3022_v12, %v597_v38  ;;  %3027 = vrcp.f32 %v734_v14 }
  0xd3   : > { %v3907_v19 = vadd.f32 %v604_v16, %v3844_v13  ;;  %3029 = vrcp.f32 %v735_v20  ;;  %v2730_v14 = vor.u32 %v2936_v6, %v2729_v5  ;;  %v2952_v16 = vld [vmem:[#allocation2 + $0xf4] sm:$0xf0]  ;;  %v2785_v6 = vld [vmem:[#allocation2 + $0xe0] sm:$0xf] }
  0xd4   : > { %v642_v22 = vsub.f32 0.0, %v3899_v15  ;;  %1048 = vmatmul.bf16.vlgmr.msra.gmra.mxu2 %v826_v17  ;;  %1146 = vmatmul.bf16.vlgmr.msrb.gmra.mxu0 %v826_v17  ;;  %v827_v24 = vpack.c.bf16 %v3909_v21, %v3904_v18 }
  0xd5   : > { %v643_v23 = vsub.f32 0.0, %v3907_v19  ;;  %1674 = vmatpush.bf16.msrb.mxu2 %v2730_v14 }
  0xd6   : > { %v3024_v26 = vpop.eup %3023  ;;  %v682_v27 = vmul.f32 1.442695, %v642_v22  ;;  %1097 = vmatmul.bf16.vlgmr.msra.gmra.mxu3 %v827_v24  ;;  %1195 = vmatmul.bf16.vlgmr.msrb.gmra.mxu1 %v827_v24  ;;  %v2794_v22 = vor.u32 %v2952_v16, %v2793_v7  ;;  %v2950_v7 = vld [vmem:[#allocation2 + $0xe4] sm:$0xf0] }
  0xd7   : > { %v736_v25 = vadd.f32 1.0, %v3024_v26  ;;  %v684_v28 = vmul.f32 1.442695, %v643_v23  ;;  %v3026_v29 = vpop.eup %3025  ;;  %v2786_v14 = vor.u32 %v2950_v7, %v2785_v6  ;;  %v2777_v6 = vld [vmem:[#allocation2 + $0xd0] sm:$0xf] }
  0xd8   : > { %3031 = vpow2.f32 %v682_v27  ;;  %v737_v30 = vadd.f32 1.0, %v3026_v29  ;;  %v3028_v35 = vpop.eup %3027  ;;  %1723 = vmatpush.bf16.msrb.mxu3 %v2794_v22  ;;  %v2948_v7 = vld [vmem:[#allocation2 + $0xd4] sm:$0xf0] }
  0xd9   : > { %3033 = vrcp.f32 %v736_v25  ;;  %v557_v31 = vpop.f32.mrf.mxu0  ;;  %v3030_v37 = vpop.eup %3029  ;;  %v3924_v44 = vmul.f32 %v3028_v35, %v3881_v47 }
  0xda   : > { %3035 = vpow2.f32 %v684_v28  ;;  %v3916_v32 = vadd.f32 %v557_v31, %v3836_v8  ;;  %v606_v33 = vpop.f32.mrf.mxu1  ;;  %v3929_v48 = vmul.f32 %v3030_v37, %v3884_v50 }
  0xdb   : > { %3037 = vrcp.f32 %v737_v30  ;;  %v3919_v34 = vadd.f32 %v606_v33, %v3844_v13 }
  0xdc   : > { %v644_v36 = vsub.f32 0.0, %v3916_v32  ;;  %1724 = vmatpush.bf16.msrb.mxu3 %v2786_v14  ;;  %v2778_v14 = vor.u32 %v2948_v7, %v2777_v6 }
  0xdd   : > { %v645_v38 = vsub.f32 0.0, %v3919_v34 }
  0xde   : > { %v3032_v39 = vpop.eup %3031  ;;  %v686_v40 = vmul.f32 1.442695, %v644_v36 }
  0xdf   : > { %v3034_v41 = vpop.eup %3033  ;;  %v688_v42 = vmul.f32 1.442695, %v645_v38  ;;  %v738_v49 = vadd.f32 1.0, %v3032_v39 }
  0xe0   : > { %v3036_v43 = vpop.eup %3035  ;;  %3039 = vpow2.f32 %v686_v40  ;;  %v3926_v45 = vmul.f32 %v3034_v41, %v553_v60  ;;  %1725 = vmatpush.bf16.msrb.mxu3 %v2778_v14  ;;  %v2769_v14 = vld [vmem:[#allocation2 + $0xc0] sm:$0xf] }
  0xe1   : > { %v3038_v46 = vpop.eup %3037  ;;  %v560_v51 = vpop.f32.mrf.mxu0  ;;  %3041 = vpow2.f32 %v688_v42  ;;  %v739_v55 = vadd.f32 1.0, %v3036_v43 }
  0xe2   : > { %v3932_v52 = vadd.f32 %v560_v51, %v3836_v8  ;;  %v609_v53 = vpop.f32.mrf.mxu1  ;;  %v828_v54 = vpack.c.bf16 %v3926_v45, %v3924_v44  ;;  %v3937_v47 = vmul.f32 %v3038_v46, %v3890_v62  ;;  %3043 = vrcp.f32 %v738_v49 }
  0xe3   : > { %v3940_v56 = vadd.f32 %v609_v53, %v3844_v13  ;;  %3045 = vrcp.f32 %v739_v55 }
  0xe4   : > { %v646_v50 = vsub.f32 0.0, %v3932_v52  ;;  %1053 = vmatmul.bf16.gmra.mxu2 %v828_v54  ;;  %v829_v57 = vpack.c.bf16 %v3937_v47, %v3929_v48  ;;  %1151 = vmatmul.bf16.gmra.mxu0 %v828_v54 }
  0xe5   : > { %v647_v58 = vsub.f32 0.0, %v3940_v56 }
  0xe6   : > { %v3040_v59 = vpop.eup %3039  ;;  %v690_v60 = vmul.f32 1.442695, %v646_v50  ;;  %1102 = vmatmul.bf16.gmra.mxu3 %v829_v57  ;;  %1200 = vmatmul.bf16.gmra.mxu1 %v829_v57  ;;  %v2935_v50 = vld [vmem:[#allocation2 + $0x74] sm:$0xf]  ;;  %v2731_v57 = vld [vmem:[#allocation2 + $0x78] sm:$0xf0] }
  0xe7   : > { %v740_v61 = vadd.f32 1.0, %v3040_v59  ;;  %v692_v62 = vmul.f32 1.442695, %v647_v58  ;;  %v3042_v63 = vpop.eup %3041  ;;  %v2951_v58 = vld [vmem:[#allocation2 + $0xf4] sm:$0xf] }
  0xe8   : > { %3047 = vpow2.f32 %v690_v60  ;;  %v741_v0 = vadd.f32 1.0, %v3042_v63  ;;  %v3044_v11 = vpop.eup %3043  ;;  %v2734_v60 = vor.u32 %v2935_v50, %v2731_v57  ;;  %v2934_v63 = vld [vmem:[#allocation2 + $0x64] sm:$0xf0]  ;;  %v2723_v50 = vld [vmem:[#allocation2 + $0x68] sm:$0xf0] }
  0xe9   : > { %3049 = vrcp.f32 %v740_v61  ;;  %v562_v1 = vpop.f32.mrf.mxu0  ;;  %v3046_v17 = vpop.eup %3045  ;;  %v3955_v28 = vmul.f32 %v3044_v11, %v3899_v15  ;;  %v2795_v61 = vld [vmem:[#allocation2 + $0xf8] sm:$0xf0]  ;;  %v2949_v57 = vld [vmem:[#allocation2 + $0xe4] sm:$0xf] }
  0xea   : > { %3051 = vpow2.f32 %v692_v62  ;;  %v3947_v2 = vadd.f32 %v562_v1, %v3836_v8  ;;  %v611_v3 = vpop.f32.mrf.mxu1  ;;  %v3961_v31 = vmul.f32 %v3046_v17, %v3907_v19  ;;  %v2721_v62 = vld [vmem:[#allocation2 + $0x60] sm:$0xf]  ;;  %1772 = vmatpush.bf16.msra.mxu0 %v2734_v60 }
  0xeb   : > { %3053 = vrcp.f32 %v741_v0  ;;  %v3950_v4 = vadd.f32 %v611_v3, %v3844_v13  ;;  %v2798_v3 = vor.u32 %v2951_v58, %v2795_v61  ;;  %v2722_v5 = vor.u32 %v2934_v63, %v2721_v62  ;;  %v2787_v61 = vld [vmem:[#allocation2 + $0xe8] sm:$0xf0]  ;;  %v2713_v62 = vld [vmem:[#allocation2 + $0x50] sm:$0xf]  ;;  %v2932_v63 = vld [vmem:[#allocation2 + $0x54] sm:$0xf0] }
  0xec   : > { %v648_v12 = vsub.f32 0.0, %v3947_v2 }
  0xed   : > { %v649_v20 = vsub.f32 0.0, %v3950_v4  ;;  %1821 = vmatpush.bf16.msra.mxu1 %v2798_v3  ;;  %1675 = vmatpush.bf16.msrb.mxu2 %v2722_v5  ;;  %v2790_v3 = vor.u32 %v2949_v57, %v2787_v61  ;;  %v2714_v5 = vor.u32 %v2932_v63, %v2713_v62  ;;  %v2715_v61 = vld [vmem:[#allocation2 + $0x58] sm:$0xf0]  ;;  %v2947_v62 = vld [vmem:[#allocation2 + $0xd4] sm:$0xf] }
  0xee   : > { %v3048_v23 = vpop.eup %3047  ;;  %v694_v24 = vmul.f32 1.442695, %v648_v12 }
  0xef   : > { %v3050_v26 = vpop.eup %3049  ;;  %v696_v27 = vmul.f32 1.442695, %v649_v20  ;;  %v742_v33 = vadd.f32 1.0, %v3048_v23 }
  0xf0   : > { %v3052_v25 = vpop.eup %3051  ;;  %3055 = vpow2.f32 %v694_v24  ;;  %v3958_v29 = vmul.f32 %v3050_v26, %v3916_v32 }
  0xf1   : > { %v3054_v30 = vpop.eup %3053  ;;  %v565_v35 = vpop.f32.mrf.mxu0  ;;  %3057 = vpow2.f32 %v696_v27  ;;  %v743_v39 = vadd.f32 1.0, %v3052_v25  ;;  %1822 = vmatpush.bf16.msra.mxu1 %v2790_v3  ;;  %1676 = vmatpush.bf16.msrb.mxu2 %v2714_v5  ;;  %v2705_v3 = vld [vmem:[#allocation2 + $0x40] sm:$0xf]  ;;  %v2930_v5 = vld [vmem:[#allocation2 + $0x44] sm:$0xf0] }
  0xf2   : > { %v3964_v36 = vadd.f32 %v565_v35, %v3836_v8  ;;  %v614_v37 = vpop.f32.mrf.mxu1  ;;  %v830_v38 = vpack.c.bf16 %v3958_v29, %v3955_v28  ;;  %v3969_v15 = vmul.f32 %v3054_v30, %v3919_v34  ;;  %3059 = vrcp.f32 %v742_v33 }
  0xf3   : > { %v3972_v32 = vadd.f32 %v614_v37, %v3844_v13  ;;  %3061 = vrcp.f32 %v743_v39 }
  0xf4   : > { %v650_v19 = vsub.f32 0.0, %v3964_v36  ;;  %1058 = vmatmul.bf16.gmra.mxu2 %v830_v38  ;;  %v831_v40 = vpack.c.bf16 %v3969_v15, %v3961_v31  ;;  %1156 = vmatmul.bf16.gmra.mxu0 %v830_v38 }
  0xf5   : > { %v651_v41 = vsub.f32 0.0, %v3972_v32 }
  0xf6   : > { %v3056_v42 = vpop.eup %3055  ;;  %v698_v43 = vmul.f32 1.442695, %v650_v19  ;;  %1107 = vmatmul.bf16.gmra.mxu3 %v831_v40  ;;  %1205 = vmatmul.bf16.gmra.mxu1 %v831_v40 }
  0xf7   : > { %v744_v46 = vadd.f32 1.0, %v3056_v42  ;;  %v700_v34 = vmul.f32 1.442695, %v651_v41  ;;  %v3058_v49 = vpop.eup %3057 }
  0xf8   : > { %3063 = vpow2.f32 %v698_v43  ;;  %v745_v51 = vadd.f32 1.0, %v3058_v49  ;;  %v3060_v0 = vpop.eup %3059 }
  0xf9   : > { %3065 = vrcp.f32 %v744_v46  ;;  %v567_v53 = vpop.f32.mrf.mxu0  ;;  %v3062_v11 = vpop.eup %3061  ;;  %v3987_v24 = vmul.f32 %v3060_v0, %v3932_v52 }
  0xfa   : > { %3067 = vpow2.f32 %v700_v34  ;;  %v3979_v54 = vadd.f32 %v567_v53, %v3836_v8  ;;  %v616_v55 = vpop.f32.mrf.mxu1  ;;  %v3993_v25 = vmul.f32 %v3062_v11, %v3940_v56 }
  0xfb   : > { %3069 = vrcp.f32 %v745_v51  ;;  %v3982_v59 = vadd.f32 %v616_v55, %v3844_v13  ;;  %v2933_v55 = vld [vmem:[#allocation2 + $0x64] sm:$0xf] }
  0xfc   : > { %v652_v1 = vsub.f32 0.0, %v3979_v54  ;;  %v2726_v60 = vor.u32 %v2933_v55, %v2723_v50 }
  0xfd   : > { %v653_v12 = vsub.f32 0.0, %v3982_v59 }
  0xfe   : > { %v3064_v16 = vpop.eup %3063  ;;  %v702_v17 = vmul.f32 1.442695, %v652_v1  ;;  %1773 = vmatpush.bf16.msra.mxu0 %v2726_v60  ;;  %v2931_v60 = vld [vmem:[#allocation2 + $0x54] sm:$0xf] }
  0xff   : > { %v3066_v20 = vpop.eup %3065  ;;  %v704_v22 = vmul.f32 1.442695, %v653_v12  ;;  %v746_v30 = vadd.f32 1.0, %v3064_v16 }
 0x100   : > { %v3068_v23 = vpop.eup %3067  ;;  %3071 = vpow2.f32 %v702_v17  ;;  %v3990_v26 = vmul.f32 %v3066_v20, %v3947_v2 }
 0x101   : > { %v3070_v27 = vpop.eup %3069  ;;  %v570_v33 = vpop.f32.mrf.mxu0  ;;  %3073 = vpow2.f32 %v704_v22  ;;  %v747_v39 = vadd.f32 1.0, %v3068_v23 }
 0x102   : > { %v3996_v35 = vadd.f32 %v570_v33, %v3836_v8  ;;  %v619_v37 = vpop.f32.mrf.mxu1  ;;  %v832_v38 = vpack.c.bf16 %v3990_v26, %v3987_v24  ;;  %v4001_v52 = vmul.f32 %v3070_v27, %v3950_v4  ;;  %3075 = vrcp.f32 %v746_v30 }
 0x103   : > { %v4004_v2 = vadd.f32 %v619_v37, %v3844_v13  ;;  %3077 = vrcp.f32 %v747_v39 }
 0x104   : > { %v654_v56 = vsub.f32 0.0, %v3996_v35  ;;  %1063 = vmatmul.bf16.gmra.mxu2 %v832_v38  ;;  %v833_v19 = vpack.c.bf16 %v4001_v52, %v3993_v25  ;;  %1161 = vmatmul.bf16.gmra.mxu0 %v832_v38 }
 0x105   : > { %v655_v40 = vsub.f32 0.0, %v4004_v2 }
 0x106   : > { %v3072_v41 = vpop.eup %3071  ;;  %v706_v42 = vmul.f32 1.442695, %v654_v56  ;;  %1112 = vmatmul.bf16.gmra.mxu3 %v833_v19  ;;  %1210 = vmatmul.bf16.gmra.mxu1 %v833_v19 }
 0x107   : > { %v748_v43 = vadd.f32 1.0, %v3072_v41  ;;  %v708_v4 = vmul.f32 1.442695, %v655_v40  ;;  %v3074_v46 = vpop.eup %3073 }
 0x108   : > { %3079 = vpow2.f32 %v706_v42  ;;  %v749_v34 = vadd.f32 1.0, %v3074_v46  ;;  %v3076_v0 = vpop.eup %3075 }
 0x109   : > { %3081 = vrcp.f32 %v748_v43  ;;  %v572_v49 = vpop.f32.mrf.mxu0  ;;  %v3078_v11 = vpop.eup %3077  ;;  %v4019_v27 = vmul.f32 %v3076_v0, %v3964_v36  ;;  %v2718_v0 = vor.u32 %v2931_v60, %v2715_v61 }
 0x10a   : > { %3083 = vpow2.f32 %v708_v4  ;;  %v4011_v51 = vadd.f32 %v572_v49, %v3836_v8  ;;  %v621_v53 = vpop.f32.mrf.mxu1  ;;  %v4025_v37 = vmul.f32 %v3078_v11, %v3972_v32 }
 0x10b   : > { %3085 = vrcp.f32 %v749_v34  ;;  %v4014_v58 = vadd.f32 %v621_v53, %v3844_v13  ;;  %1774 = vmatpush.bf16.msra.mxu0 %v2718_v0 }
 0x10c   : > { %v656_v1 = vsub.f32 0.0, %v4011_v51 }
 0x10d   : > { %v657_v12 = vsub.f32 0.0, %v4014_v58 }
 0x10e   : > { %v3080_v16 = vpop.eup %3079  ;;  %v710_v17 = vmul.f32 1.442695, %v656_v1  ;;  %v2779_v1 = vld [vmem:[#allocation2 + $0xd8] sm:$0xf0] }
 0x10f   : > { %v3082_v20 = vpop.eup %3081  ;;  %v712_v22 = vmul.f32 1.442695, %v657_v12  ;;  %v750_v38 = vadd.f32 1.0, %v3080_v16  ;;  %v2782_v11 = vor.u32 %v2947_v62, %v2779_v1  ;;  %v2706_v12 = vor.u32 %v2930_v5, %v2705_v3  ;;  %v2946_v16 = vld [vmem:[#allocation2 + $0xc4] sm:$0xf0] }
 0x110   : > { %v3084_v23 = vpop.eup %3083  ;;  %3087 = vpow2.f32 %v710_v17  ;;  %v4022_v30 = vmul.f32 %v3082_v20, %v3979_v54 }
 0x111   : > { %v3086_v33 = vpop.eup %3085  ;;  %v575_v39 = vpop.f32.mrf.mxu0  ;;  %3089 = vpow2.f32 %v712_v22  ;;  %v751_v41 = vadd.f32 1.0, %v3084_v23  ;;  %v2770_v22 = vor.u32 %v2946_v16, %v2769_v14  ;;  %v2929_v23 = vld [vmem:[#allocation2 + $0x44] sm:$0xf]  ;;  %1823 = vmatpush.bf16.msra.mxu1 %v2782_v11  ;;  %1677 = vmatpush.bf16.msrb.mxu2 %v2706_v12 }
 0x112   : > { %v4028_v56 = vadd.f32 %v575_v39, %v3836_v8  ;;  %v624_v19 = vpop.f32.mrf.mxu1  ;;  %v834_v40 = vpack.c.bf16 %v4022_v30, %v4019_v27  ;;  %v4033_v36 = vmul.f32 %v3086_v33, %v3982_v59  ;;  %3091 = vrcp.f32 %v750_v38  ;;  %v2707_v33 = vld [vmem:[#allocation2 + $0x48] sm:$0xf0] }
 0x113   : > { %v4036_v54 = vadd.f32 %v624_v19, %v3844_v13  ;;  %3093 = vrcp.f32 %v751_v41  ;;  %v2710_v19 = vor.u32 %v2929_v23, %v2707_v33  ;;  %v2771_v41 = vld [vmem:[#allocation2 + $0xc8] sm:$0xf0]  ;;  %1726 = vmatpush.bf16.msrb.mxu3 %v2770_v22  ;;  %v2699_v23 = vld [vmem:[#allocation2 + $0x38] sm:$0xf0]  ;;  %v2943_v33 = vld [vmem:[#allocation2 + $0xb4] sm:$0xf] }
 0x114   : > { %v658_v32 = vsub.f32 0.0, %v4028_v56  ;;  %1068 = vmatmul.bf16.gmra.mxu2 %v834_v40  ;;  %v835_v42 = vpack.c.bf16 %v4033_v36, %v4025_v37  ;;  %1166 = vmatmul.bf16.gmra.mxu0 %v834_v40  ;;  %v2945_v40 = vld [vmem:[#allocation2 + $0xc4] sm:$0xf] }
 0x115   : > { %v659_v43 = vsub.f32 0.0, %v4036_v54  ;;  %1775 = vmatpush.bf16.msra.mxu0 %v2710_v19 }
 0x116   : > { %v3088_v4 = vpop.eup %3087  ;;  %v714_v46 = vmul.f32 1.442695, %v658_v32  ;;  %1117 = vmatmul.bf16.gmra.mxu3 %v835_v42  ;;  %1215 = vmatmul.bf16.gmra.mxu1 %v835_v42 }
 0x117   : > { %v752_v34 = vadd.f32 1.0, %v3088_v4  ;;  %v716_v59 = vmul.f32 1.442695, %v659_v43  ;;  %v3090_v49 = vpop.eup %3089  ;;  %v2774_v43 = vor.u32 %v2945_v40, %v2771_v41  ;;  %v2697_v4 = vld [vmem:[#allocation2 + $0x30] sm:$0xf] }
 0x118   : > { %3095 = vpow2.f32 %v714_v46  ;;  %v753_v53 = vadd.f32 1.0, %v3090_v49  ;;  %v3092_v6 = vpop.eup %3091  ;;  %v2928_v49 = vld [vmem:[#allocation2 + $0x34] sm:$0xf0] }
 0x119   : > { %3097 = vrcp.f32 %v752_v34  ;;  %v577_v55 = vpop.f32.mrf.mxu0  ;;  %v3094_v17 = vpop.eup %3093  ;;  %v4051_v34 = vmul.f32 %v3092_v6, %v3996_v35  ;;  %v2698_v0 = vor.u32 %v2928_v49, %v2697_v4  ;;  %1824 = vmatpush.bf16.msra.mxu1 %v2774_v43  ;;  %v2753_v49 = vld [vmem:[#allocation2 + $0xa0] sm:$0xf] }
 0x11a   : > { %3099 = vpow2.f32 %v716_v59  ;;  %v4043_v50 = vadd.f32 %v577_v55, %v3836_v8  ;;  %v626_v57 = vpop.f32.mrf.mxu1  ;;  %v2944_v55 = vld [vmem:[#allocation2 + $0xb4] sm:$0xf0]  ;;  %v4057_v60 = vmul.f32 %v3094_v17, %v4004_v2 }
 0x11b   : > { %3101 = vrcp.f32 %v753_v53  ;;  %v4046_v63 = vadd.f32 %v626_v57, %v3844_v13  ;;  %v2761_v53 = vld [vmem:[#allocation2 + $0xb0] sm:$0xf]  ;;  %1678 = vmatpush.bf16.msrb.mxu2 %v2698_v0 }
 0x11c   : > { %v660_v7 = vsub.f32 0.0, %v4043_v50  ;;  %v2762_v1 = vor.u32 %v2944_v55, %v2761_v53  ;;  %v2942_v53 = vld [vmem:[#allocation2 + $0xa4] sm:$0xf0] }
 0x11d   : > { %v661_v20 = vsub.f32 0.0, %v4046_v63 }
 0x11e   : > { %v3096_v38 = vpop.eup %3095  ;;  %v718_v39 = vmul.f32 1.442695, %v660_v7  ;;  %1727 = vmatpush.bf16.msrb.mxu3 %v2762_v1 }
 0x11f   : > { %v3098_v32 = vpop.eup %3097  ;;  %v720_v42 = vmul.f32 1.442695, %v661_v20  ;;  %v754_v61 = vadd.f32 1.0, %v3096_v38  ;;  %v2927_v20 = vld [vmem:[#allocation2 + $0x34] sm:$0xf] }
 0x120   : > { %v3100_v46 = vpop.eup %3099  ;;  %3103 = vpow2.f32 %v718_v39  ;;  %v4054_v59 = vmul.f32 %v3098_v32, %v4011_v51  ;;  %v2763_v38 = vld [vmem:[#allocation2 + $0xb8] sm:$0xf0]  ;;  %v2702_v40 = vor.u32 %v2927_v20, %v2699_v23  ;;  %v2689_v32 = vld [vmem:[#allocation2 + $0x20] sm:$0xf] }
 0x121   : > { %v3102_v57 = vpop.eup %3101  ;;  %v580_v62 = vpop.f32.mrf.mxu0  ;;  %3105 = vpow2.f32 %v720_v42  ;;  %v755_v6 = vadd.f32 1.0, %v3100_v46  ;;  %v2766_v41 = vor.u32 %v2943_v33, %v2763_v38  ;;  %v2926_v42 = vld [vmem:[#allocation2 + $0x24] sm:$0xf0] }
 0x122   : > { %v4060_v35 = vadd.f32 %v580_v62, %v3836_v8  ;;  %v629_v3 = vpop.f32.mrf.mxu1  ;;  %v836_v51 = vpack.c.bf16 %v4054_v59, %v4051_v34  ;;  %v4065_v5 = vmul.f32 %v3102_v57, %v4014_v58  ;;  %3107 = vrcp.f32 %v754_v61  ;;  %1776 = vmatpush.bf16.msra.mxu0 %v2702_v40 }
 0x123   : > { %v4068_v2 = vadd.f32 %v629_v3, %v3844_v13  ;;  %3109 = vrcp.f32 %v755_v6  ;;  %v2690_v46 = vor.u32 %v2926_v42, %v2689_v32  ;;  %1825 = vmatpush.bf16.msra.mxu1 %v2766_v41  ;;  %v2754_v57 = vor.u32 %v2942_v53, %v2753_v49 }
 0x124   : > { %v662_v7 = vsub.f32 0.0, %v4060_v35  ;;  %1073 = vmatmul.bf16.gmra.mxu2 %v836_v51  ;;  %v837_v11 = vpack.c.bf16 %v4065_v5, %v4057_v60  ;;  %1171 = vmatmul.bf16.gmra.mxu0 %v836_v51 }
 0x125   : > { %v663_v12 = vsub.f32 0.0, %v4068_v2  ;;  %1679 = vmatpush.bf16.msrb.mxu2 %v2690_v46  ;;  %1728 = vmatpush.bf16.msrb.mxu3 %v2754_v57  ;;  %v2691_v46 = vld [vmem:[#allocation2 + $0x28] sm:$0xf0] }
 0x126   : > { %v3104_v14 = vpop.eup %3103  ;;  %v722_v58 = vmul.f32 1.442695, %v662_v7  ;;  %1122 = vmatmul.bf16.gmra.mxu3 %v837_v11  ;;  %1220 = vmatmul.bf16.gmra.mxu1 %v837_v11  ;;  %v2755_v57 = vld [vmem:[#allocation2 + $0xa8] sm:$0xf0] }
 0x127   : > { %v756_v16 = vadd.f32 1.0, %v3104_v14  ;;  %v724_v17 = vmul.f32 1.442695, %v663_v12  ;;  %v3106_v22 = vpop.eup %3105 }
 0x128   : > { %3111 = vpow2.f32 %v722_v58  ;;  %v757_v39 = vadd.f32 1.0, %v3106_v22  ;;  %v3108_v61 = vpop.eup %3107 }
 0x129   : > { %3113 = vrcp.f32 %v756_v16  ;;  %v582_v19 = vpop.f32.mrf.mxu0  ;;  %v3110_v0 = vpop.eup %3109  ;;  %v4077_v11 = vmul.f32 %v3108_v61, %v4028_v56 }
 0x12a   : > { %3115 = vpow2.f32 %v724_v17  ;;  %v583_v43 = vadd.f32 %v582_v19, %v3836_v8  ;;  %v631_v4 = vpop.f32.mrf.mxu1  ;;  %v4083_v14 = vmul.f32 %v3110_v0, %v4036_v54  ;;  %v2940_v0 = vld [vmem:[#allocation2 + $0x94] sm:$0xf0] }
 0x12b   : > { %3117 = vrcp.f32 %v757_v39  ;;  %v632_v55 = vadd.f32 %v631_v4, %v3844_v13 }
 0x12c   : > { %v664_v62 = vsub.f32 0.0, %v583_v43 }
 0x12d   : > { %v665_v1 = vsub.f32 0.0, %v632_v55 }
 0x12e   : > { %v3112_v3 = vpop.eup %3111  ;;  %v726_v51 = vmul.f32 1.442695, %v664_v62  ;;  %v2745_v62 = vld [vmem:[#allocation2 + $0x90] sm:$0xf] }
 0x12f   : > { %v3114_v6 = vpop.eup %3113  ;;  %v728_v8 = vmul.f32 1.442695, %v665_v1  ;;  %v758_v17 = vadd.f32 1.0, %v3112_v3  ;;  %v2939_v1 = vld [vmem:[#allocation2 + $0x94] sm:$0xf] }
 0x130   : > { %v3116_v7 = vpop.eup %3115  ;;  %3119 = vpow2.f32 %v726_v51  ;;  %v4080_v13 = vmul.f32 %v3114_v6, %v4043_v50  ;;  %v2746_v51 = vor.u32 %v2940_v0, %v2745_v62  ;;  %v2747_v6 = vld [vmem:[#allocation2 + $0x98] sm:$0xf0]  ;;  %v2922_v62 = vld [vmem:[#allocation2 + $0x4] sm:$0xf0]  ;;  %v2921_v0 = vld [vmem:[#allocation2 + $0x4] sm:$0xf] }
 0x131   : > { %v3118_v12 = vpop.eup %3117  ;;  %3121 = vpow2.f32 %v728_v8  ;;  %v759_v20 = vadd.f32 1.0, %v3116_v7  ;;  %v2750_v8 = vor.u32 %v2939_v1, %v2747_v6 }
 0x132   : > { %v838_v58 = vpack.c.bf16 %v4080_v13, %v4077_v11  ;;  %v4088_v16 = vmul.f32 %v3118_v12, %v4046_v63  ;;  %3123 = vrcp.f32 %v758_v17  ;;  %1729 = vmatpush.bf16.msrb.mxu3 %v2746_v51  ;;  %v2681_v17 = vld [vmem:[#allocation2 + $0x10] sm:$0xf]  ;;  %v2675_v51 = vld [vmem:[#allocation2 + $0x8] sm:$0xf0] }
 0x133   : > { %3125 = vrcp.f32 %v759_v20  ;;  %v2924_v20 = vld [vmem:[#allocation2 + $0x14] sm:$0xf0] }
 0x134   : > { %1078 = vmatmul.bf16.gmra.mxu2 %v838_v58  ;;  %v839_v56 = vpack.c.bf16 %v4088_v16, %v4083_v14  ;;  %1176 = vmatmul.bf16.gmra.mxu0 %v838_v58 }
 0x136   : > { %v3120_v50 = vpop.eup %3119  ;;  %1127 = vmatmul.bf16.gmra.mxu3 %v839_v56  ;;  %1225 = vmatmul.bf16.gmra.mxu1 %v839_v56  ;;  %v2737_v56 = vld [vmem:[#allocation2 + $0x80] sm:$0xf] }
 0x137   : > { %v760_v22 = vadd.f32 1.0, %v3120_v50  ;;  %v3122_v54 = vpop.eup %3121  ;;  %v2682_v50 = vor.u32 %v2924_v20, %v2681_v17 }
 0x138   : > { %v761_v23 = vadd.f32 1.0, %v3122_v54  ;;  %v3124_v33 = vpop.eup %3123  ;;  %v2937_v54 = vld [vmem:[#allocation2 + $0x84] sm:$0xf] }
 0x139   : > { %3127 = vrcp.f32 %v760_v22  ;;  %v3126_v63 = vpop.eup %3125  ;;  %v4093_v39 = vmul.f32 %v3124_v33, %v4060_v35  ;;  %v874_v35 = vld [vmem:[%s4622_s4] sm:$0x3]  ;;  %v2938_v22 = vld [vmem:[#allocation2 + $0x84] sm:$0xf0]  ;;  %1680 = vmatpush.bf16.msrb.mxu2 %v2682_v50 }
 0x13a   : > { %3129 = vrcp.f32 %v761_v23  ;;  %v4098_v41 = vmul.f32 %v3126_v63, %v4068_v2  ;;  %v2941_v2 = vld [vmem:[#allocation2 + $0xa4] sm:$0xf]  ;;  %v4109_v49 = vperm.slane %v874_v35, 1  ;;  %v4112_v12 = vperm.slane %v874_v35, 0  ;;  %v2739_v23 = vld [vmem:[#allocation2 + $0x88] sm:$0xf0] }
 0x13f   : > { %v3128_v38 = vpop.eup %3127 }
 0x140   : > { %v4095_v19 = vmul.f32 %v3128_v38, %v583_v43  ;;  %v3130_v40 = vpop.eup %3129  ;;  %v2925_v43 = vld [vmem:[#allocation2 + $0x24] sm:$0xf]  ;;  %v2923_v38 = vld [vmem:[#allocation2 + $0x14] sm:$0xf] }
 0x141   : > { %v4102_v42 = vmul.f32 %v3130_v40, %v632_v55  ;;  %v2694_v53 = vor.u32 %v2925_v43, %v2691_v46  ;;  %v2758_v55 = vor.u32 %v2941_v2, %v2755_v57  ;;  %v2683_v40 = vld [vmem:[#allocation2 + $0x18] sm:$0xf0] }
 0x142   : > { %v840_v32 = vpack.c.bf16 %v4095_v19, %v4093_v39  ;;  %v2686_v43 = vor.u32 %v2923_v38, %v2683_v40 }
 0x143   : > { %v841_v4 = vpack.c.bf16 %v4102_v42, %v4098_v41  ;;  %1777 = vmatpush.bf16.msra.mxu0 %v2694_v53  ;;  %1826 = vmatpush.bf16.msra.mxu1 %v2758_v55 }
 0x144   : > { %1083 = vmatmul.bf16.gmra.mxu2 %v840_v32  ;;  %1181 = vmatmul.bf16.gmra.mxu0 %v840_v32  ;;  %v2738_v32 = vor.u32 %v2938_v22, %v2737_v56 }
 0x146   : > { %1132 = vmatmul.bf16.gmra.mxu3 %v841_v4  ;;  %1230 = vmatmul.bf16.gmra.mxu1 %v841_v4  ;;  %v2742_v4 = vor.u32 %v2937_v54, %v2739_v23 }
 0x147   : > { %1827 = vmatpush.bf16.msra.mxu1 %v2750_v8  ;;  %1730 = vmatpush.bf16.msrb.mxu3 %v2738_v32 }
 0x148   : > { %1778 = vmatpush.bf16.msra.mxu0 %v2686_v43 }
 0x14b   : > { %1828 = vmatpush.bf16.msra.mxu1 %v2742_v4 }
 0x151   : > { %v1147_v61 = vpop.f32.mrf.mxu0 }
 0x152   : > { %v1148_v3 = vadd.f32 %v1147_v61, %v4109_v49  ;;  %v2673_v61 = vld [vmem:[#allocation2] sm:$0xf] }
 0x153   : > { %v1196_v7 = vpop.f32.mrf.mxu1 }
 0x154   : > { %v4114_v58 = vadd.f32 %v1196_v7, %v1148_v3  ;;  %v2674_v3 = vor.u32 %v2922_v62, %v2673_v61  ;;  %v2678_v7 = vor.u32 %v2921_v0, %v2675_v51 }
 0x156   : > { %v1237_v33 = vsub.f32 0.0, %v4114_v58  ;;  %1681 = vmatpush.bf16.msrb.mxu2 %v2674_v3  ;;  %1779 = vmatpush.bf16.msra.mxu0 %v2678_v7 }
 0x157   : > { %v1049_v63 = vpop.f32.mrf.mxu2 }
 0x158   : > { %v1050_v35 = vadd.f32 %v1049_v63, %v4112_v12  ;;  %v1270_v46 = vmul.f32 1.442695, %v1237_v33 }
 0x159   : > { %v1149_v2 = vpop.f32.mrf.mxu0  ;;  %v1098_v53 = vpop.f32.mrf.mxu3 }
 0x15a   : > { %v1150_v57 = vadd.f32 %v1149_v2, %v4109_v49  ;;  %3131 = vpow2.f32 %v1270_v46  ;;  %v4119_v55 = vadd.f32 %v1098_v53, %v1050_v35 }
 0x15b   : > { %v1198_v1 = vpop.f32.mrf.mxu1 }
 0x15c   : > { %v1236_v6 = vsub.f32 0.0, %v4119_v55  ;;  %v1199_v8 = vadd.f32 %v1198_v1, %v1150_v57 }
 0x15e   : > { %v1268_v17 = vmul.f32 1.442695, %v1236_v6  ;;  %v1239_v20 = vsub.f32 0.0, %v1199_v8 }
 0x15f   : > { %v1051_v56 = vpop.f32.mrf.mxu2 }
 0x160   : > { %v1052_v50 = vadd.f32 %v1051_v56, %v4112_v12  ;;  %v3132_v22 = vpop.eup %3131  ;;  %3133 = vpow2.f32 %v1268_v17  ;;  %v1274_v54 = vmul.f32 1.442695, %v1239_v20 }
 0x161   : > { %v1152_v23 = vpop.f32.mrf.mxu0  ;;  %v1100_v33 = vpop.f32.mrf.mxu3  ;;  %v1333_v40 = vadd.f32 1.0, %v3132_v22 }
 0x162   : > { %v1153_v63 = vadd.f32 %v1152_v23, %v4109_v49  ;;  %3135 = vpow2.f32 %v1274_v54  ;;  %v1101_v38 = vadd.f32 %v1100_v33, %v1052_v50 }
 0x163   : > { %v1201_v32 = vpop.f32.mrf.mxu1  ;;  %3137 = vrcp.f32 %v1333_v40 }
 0x164   : > { %v1238_v4 = vsub.f32 0.0, %v1101_v38  ;;  %v4124_v35 = vadd.f32 %v1201_v32, %v1153_v63 }
 0x166   : > { %v3134_v43 = vpop.eup %3133  ;;  %v1272_v46 = vmul.f32 1.442695, %v1238_v4  ;;  %v1241_v2 = vsub.f32 0.0, %v4124_v35 }
 0x167   : > { %v1054_v53 = vpop.f32.mrf.mxu2  ;;  %v1332_v1 = vadd.f32 1.0, %v3134_v43 }
 0x168   : > { %v1055_v57 = vadd.f32 %v1054_v53, %v4112_v12  ;;  %v3136_v61 = vpop.eup %3135  ;;  %3139 = vpow2.f32 %v1272_v46  ;;  %v1278_v62 = vmul.f32 1.442695, %v1241_v2 }
 0x169   : > { %v1154_v0 = vpop.f32.mrf.mxu0  ;;  %v1335_v3 = vadd.f32 1.0, %v3136_v61  ;;  %v1103_v51 = vpop.f32.mrf.mxu3 }
 0x16a   : > { %v1155_v6 = vadd.f32 %v1154_v0, %v4109_v49  ;;  %3141 = vpow2.f32 %v1278_v62  ;;  %v4129_v7 = vadd.f32 %v1103_v51, %v1055_v57  ;;  %v3138_v50 = vpop.eup %3137 }
 0x16b   : > { %3143 = vrcp.f32 %v1335_v3  ;;  %v1203_v17 = vpop.f32.mrf.mxu1  ;;  %v1397_v4 = vmul.f32 %v3138_v50, %v4114_v58 }
 0x16c   : > { %v1240_v20 = vsub.f32 0.0, %v4129_v7  ;;  %v4132_v56 = vadd.f32 %v1203_v17, %v1155_v6  ;;  %3145 = vrcp.f32 %v1332_v1 }
 0x16d   : > { %v4141_v51 = vadd.f32 %v1397_v4, %v3904_v18 }
 0x16e   : > { %v3140_v22 = vpop.eup %3139  ;;  %v1276_v54 = vmul.f32 1.442695, %v1240_v20  ;;  %v1243_v23 = vsub.f32 0.0, %v4132_v56 }
 0x16f   : > { %v1056_v33 = vpop.f32.mrf.mxu2  ;;  %v1334_v63 = vadd.f32 1.0, %v3140_v22 }
 0x170   : > { %v1057_v40 = vadd.f32 %v1056_v33, %v4112_v12  ;;  %v3142_v32 = vpop.eup %3141  ;;  %3147 = vpow2.f32 %v1276_v54  ;;  %v1282_v43 = vmul.f32 1.442695, %v1243_v23 }
 0x171   : > { %v1157_v46 = vpop.f32.mrf.mxu0  ;;  %v3144_v2 = vpop.eup %3143  ;;  %3149 = vrcp.f32 %v1334_v63  ;;  %v1337_v1 = vadd.f32 1.0, %v3142_v32 }
 0x172   : > { %v1105_v53 = vpop.f32.mrf.mxu3  ;;  %v1158_v57 = vadd.f32 %v1157_v46, %v4109_v49  ;;  %v1399_v61 = vmul.f32 %v3144_v2, %v1199_v8  ;;  %3151 = vpow2.f32 %v1282_v43  ;;  %v3146_v0 = vpop.eup %3145 }
 0x173   : > { %v4138_v62 = vadd.f32 %v1105_v53, %v1057_v40  ;;  %v1206_v3 = vpop.f32.mrf.mxu1  ;;  %v1396_v50 = vmul.f32 %v3146_v0, %v4119_v55  ;;  %3153 = vrcp.f32 %v1337_v1 }
 0x174   : > { %v4144_v58 = vadd.f32 %v1399_v61, %v3909_v21  ;;  %v4147_v17 = vadd.f32 %v1206_v3, %v1158_v57 }
 0x175   : > { %v1242_v6 = vsub.f32 0.0, %v4138_v62  ;;  %v4156_v2 = vadd.f32 %v1396_v50, %v3894_v9 }
 0x176   : > { %v3148_v20 = vpop.eup %3147  ;;  %v1245_v22 = vsub.f32 0.0, %v4147_v17  ;;  %v1461_v23 = vpack.c.bf16 %v4144_v58, %v4141_v51 }
 0x177   : > { %v1280_v8 = vmul.f32 1.442695, %v1242_v6  ;;  %v1059_v54 = vpop.f32.mrf.mxu2  ;;  %v3150_v33 = vpop.eup %3149  ;;  %v1336_v4 = vadd.f32 1.0, %v3148_v20 }
 0x178   : > { %v1060_v18 = vadd.f32 %v1059_v54, %v4112_v12  ;;  %v3152_v21 = vpop.eup %3151  ;;  %v1398_v63 = vmul.f32 %v3150_v33, %v1101_v38  ;;  %v1286_v40 = vmul.f32 1.442695, %v1245_v22  ;;  %1731 = vmatmul.bf16.vlgmr.msrb.gmra.mxu3 %v1461_v23  ;;  %1829 = vmatmul.bf16.vlgmr.msra.gmra.mxu1 %v1461_v23 }
 0x179   : > { %3155 = vpow2.f32 %v1280_v8  ;;  %v1159_v32 = vpop.f32.mrf.mxu0  ;;  %v1339_v55 = vadd.f32 1.0, %v3152_v21  ;;  %v3154_v3 = vpop.eup %3153 }
 0x17a   : > { %v1108_v43 = vpop.f32.mrf.mxu3  ;;  %v1160_v46 = vadd.f32 %v1159_v32, %v4109_v49  ;;  %v4159_v53 = vadd.f32 %v1398_v63, %v3896_v10  ;;  %3157 = vpow2.f32 %v1286_v40  ;;  %v1401_v54 = vmul.f32 %v3154_v3, %v4124_v35 }
 0x17b   : > { %v4161_v57 = vadd.f32 %v1108_v43, %v1060_v18  ;;  %3159 = vrcp.f32 %v1339_v55  ;;  %v1208_v38 = vpop.f32.mrf.mxu1 }
 0x17c   : > { %v4164_v0 = vadd.f32 %v1208_v38, %v1160_v46  ;;  %v1460_v1 = vpack.c.bf16 %v4159_v53, %v4156_v2  ;;  %3161 = vrcp.f32 %v1336_v4  ;;  %v4179_v35 = vadd.f32 %v1401_v54, %v3929_v48 }
 0x17d   : > { %v1244_v61 = vsub.f32 0.0, %v4161_v57 }
 0x17e   : > { %v1247_v20 = vsub.f32 0.0, %v4164_v0  ;;  %1682 = vmatmul.bf16.vlgmr.msrb.gmra.mxu2 %v1460_v1  ;;  %1780 = vmatmul.bf16.vlgmr.msra.gmra.mxu0 %v1460_v1 }
 0x17f   : > { %v3156_v6 = vpop.eup %3155  ;;  %v1284_v9 = vmul.f32 1.442695, %v1244_v61  ;;  %v1061_v10 = vpop.f32.mrf.mxu2 }
 0x180   : > { %v1338_v50 = vadd.f32 1.0, %v3156_v6  ;;  %v1062_v8 = vadd.f32 %v1061_v10, %v4112_v12  ;;  %v3158_v22 = vpop.eup %3157  ;;  %v1290_v23 = vmul.f32 1.442695, %v1247_v20 }
 0x181   : > { %3163 = vpow2.f32 %v1284_v9  ;;  %v1162_v33 = vpop.f32.mrf.mxu0  ;;  %v3160_v18 = vpop.eup %3159  ;;  %v1341_v55 = vadd.f32 1.0, %v3158_v22 }
 0x182   : > { %3165 = vrcp.f32 %v1338_v50  ;;  %v1110_v21 = vpop.f32.mrf.mxu3  ;;  %v1163_v63 = vadd.f32 %v1162_v33, %v4109_v49  ;;  %v1403_v40 = vmul.f32 %v3160_v18, %v4132_v56  ;;  %v3162_v4 = vpop.eup %3161 }
 0x183   : > { %3167 = vpow2.f32 %v1290_v23  ;;  %v4173_v32 = vadd.f32 %v1110_v21, %v1062_v8  ;;  %v1211_v43 = vpop.f32.mrf.mxu1  ;;  %v1400_v3 = vmul.f32 %v3162_v4, %v4129_v7 }
 0x184   : > { %v4176_v38 = vadd.f32 %v1211_v43, %v1163_v63  ;;  %v4182_v61 = vadd.f32 %v1403_v40, %v3937_v47  ;;  %3169 = vrcp.f32 %v1341_v55 }
 0x185   : > { %v1246_v46 = vsub.f32 0.0, %v4173_v32  ;;  %v4194_v21 = vadd.f32 %v1400_v3, %v3924_v44 }
 0x186   : > { %v1249_v6 = vsub.f32 0.0, %v4176_v38  ;;  %v1463_v20 = vpack.c.bf16 %v4182_v61, %v4179_v35 }
 0x187   : > { %v3164_v1 = vpop.eup %3163  ;;  %v1288_v56 = vmul.f32 1.442695, %v1246_v46  ;;  %v1064_v9 = vpop.f32.mrf.mxu2 }
 0x188   : > { %v3166_v10 = vpop.eup %3165  ;;  %v1065_v50 = vadd.f32 %v1064_v9, %v4112_v12  ;;  %v1294_v47 = vmul.f32 1.442695, %v1249_v6  ;;  %1736 = vmatmul.bf16.gmra.mxu3 %v1463_v20  ;;  %1834 = vmatmul.bf16.gmra.mxu1 %v1463_v20  ;;  %v1340_v7 = vadd.f32 1.0, %v3164_v1 }
 0x189   : > { %v3168_v8 = vpop.eup %3167  ;;  %v1402_v48 = vmul.f32 %v3166_v10, %v4138_v62  ;;  %3171 = vpow2.f32 %v1288_v56  ;;  %v1164_v22 = vpop.f32.mrf.mxu0 }
 0x18a   : > { %v1343_v54 = vadd.f32 1.0, %v3168_v8  ;;  %v1113_v23 = vpop.f32.mrf.mxu3  ;;  %v1165_v33 = vadd.f32 %v1164_v22, %v4109_v49  ;;  %3173 = vpow2.f32 %v1294_v47  ;;  %v3170_v43 = vpop.eup %3169 }
 0x18b   : > { %v4191_v18 = vadd.f32 %v1113_v23, %v1065_v50  ;;  %v4197_v63 = vadd.f32 %v1402_v48, %v3926_v45  ;;  %v1213_v62 = vpop.f32.mrf.mxu1  ;;  %v1405_v9 = vmul.f32 %v3170_v43, %v4147_v17 }
 0x18c   : > { %3175 = vrcp.f32 %v1343_v54  ;;  %v4200_v4 = vadd.f32 %v1213_v62, %v1165_v33 }
 0x18d   : > { %v1248_v40 = vsub.f32 0.0, %v4191_v18  ;;  %v1462_v55 = vpack.c.bf16 %v4197_v63, %v4194_v21  ;;  %3177 = vrcp.f32 %v1340_v7  ;;  %v4215_v17 = vadd.f32 %v1405_v9, %v3961_v31 }
 0x18e   : > { %v1251_v56 = vsub.f32 0.0, %v4200_v4 }
 0x18f   : > { %v3172_v46 = vpop.eup %3171  ;;  %v1292_v1 = vmul.f32 1.442695, %v1248_v40  ;;  %1687 = vmatmul.bf16.gmra.mxu2 %v1462_v55  ;;  %1785 = vmatmul.bf16.gmra.mxu0 %v1462_v55  ;;  %v1066_v44 = vpop.f32.mrf.mxu2 }
 0x190   : > { %v1342_v45 = vadd.f32 1.0, %v3172_v46  ;;  %v1067_v3 = vadd.f32 %v1066_v44, %v4112_v12  ;;  %v3174_v6 = vpop.eup %3173  ;;  %v1298_v20 = vmul.f32 1.442695, %v1251_v56 }
 0x191   : > { %3179 = vpow2.f32 %v1292_v1  ;;  %v1167_v10 = vpop.f32.mrf.mxu0  ;;  %v1345_v54 = vadd.f32 1.0, %v3174_v6 }
 0x192   : > { %v3176_v50 = vpop.eup %3175  ;;  %3181 = vrcp.f32 %v1342_v45  ;;  %v1115_v8 = vpop.f32.mrf.mxu3  ;;  %v1168_v48 = vadd.f32 %v1167_v10, %v4109_v49 }
 0x193   : > { %v1407_v47 = vmul.f32 %v3176_v50, %v4164_v0  ;;  %3183 = vpow2.f32 %v1298_v20  ;;  %v4209_v22 = vadd.f32 %v1115_v8, %v1067_v3  ;;  %v3178_v7 = vpop.eup %3177  ;;  %v1216_v23 = vpop.f32.mrf.mxu1 }
 0x194   : > { %v4212_v62 = vadd.f32 %v1216_v23, %v1168_v48  ;;  %v1404_v43 = vmul.f32 %v3178_v7, %v4161_v57  ;;  %3185 = vrcp.f32 %v1345_v54 }
 0x195   : > { %v1250_v33 = vsub.f32 0.0, %v4209_v22  ;;  %v4218_v40 = vadd.f32 %v1407_v47, %v3969_v15 }
 0x196   : > { %v1253_v46 = vsub.f32 0.0, %v4212_v62  ;;  %v4230_v8 = vadd.f32 %v1404_v43, %v3955_v28 }
 0x197   : > { %v3180_v55 = vpop.eup %3179  ;;  %v1296_v0 = vmul.f32 1.442695, %v1250_v33  ;;  %v1069_v1 = vpop.f32.mrf.mxu2  ;;  %v1465_v56 = vpack.c.bf16 %v4218_v40, %v4215_v17 }
 0x198   : > { %v3182_v44 = vpop.eup %3181  ;;  %v1070_v45 = vadd.f32 %v1069_v1, %v4112_v12  ;;  %v1302_v15 = vmul.f32 1.442695, %v1253_v46  ;;  %v1344_v57 = vadd.f32 1.0, %v3180_v55 }
 0x199   : > { %v3184_v3 = vpop.eup %3183  ;;  %v1406_v31 = vmul.f32 %v3182_v44, %v4173_v32  ;;  %3187 = vpow2.f32 %v1296_v0  ;;  %1741 = vmatmul.bf16.gmra.mxu3 %v1465_v56  ;;  %1839 = vmatmul.bf16.gmra.mxu1 %v1465_v56  ;;  %v1169_v6 = vpop.f32.mrf.mxu0 }
 0x19a   : > { %v1347_v9 = vadd.f32 1.0, %v3184_v3  ;;  %v1118_v20 = vpop.f32.mrf.mxu3  ;;  %v1170_v10 = vadd.f32 %v1169_v6, %v4109_v49  ;;  %3189 = vpow2.f32 %v1302_v15  ;;  %v3186_v23 = vpop.eup %3185 }
 0x19b   : > { %v4227_v50 = vadd.f32 %v1118_v20, %v1070_v45  ;;  %v4233_v48 = vadd.f32 %v1406_v31, %v3958_v29  ;;  %v1218_v32 = vpop.f32.mrf.mxu1  ;;  %v1409_v1 = vmul.f32 %v3186_v23, %v4176_v38  ;;  %v2968_v23 = vld [vmem:[#allocation4 + $0x78] sm:$0xff] }
 0x19c   : > { %3191 = vrcp.f32 %v1347_v9  ;;  %v4236_v7 = vadd.f32 %v1218_v32, %v1170_v10  ;;  %2291 = vmatpush.bf16.msra.mxu3 %v2968_v23 }
 0x19d   : > { %v1252_v47 = vsub.f32 0.0, %v4227_v50  ;;  %v1464_v54 = vpack.c.bf16 %v4233_v48, %v4230_v8  ;;  %3193 = vrcp.f32 %v1344_v57  ;;  %v2960_v57 = vld [vmem:[#allocation4 + $0x38] sm:$0xff] }
 0x19e   : > { %v1255_v0 = vsub.f32 0.0, %v4236_v7  ;;  %2242 = vmatpush.bf16.msra.mxu2 %v2960_v57 }
 0x19f   : > { %v3188_v33 = vpop.eup %3187  ;;  %v1300_v55 = vmul.f32 1.442695, %v1252_v47  ;;  %1692 = vmatmul.bf16.gmra.mxu2 %v1464_v54  ;;  %1790 = vmatmul.bf16.gmra.mxu0 %v1464_v54  ;;  %v1071_v28 = vpop.f32.mrf.mxu2  ;;  %v4251_v47 = vadd.f32 %v1409_v1, %v3993_v25 }
 0x1a0   : > { %v1346_v29 = vadd.f32 1.0, %v3188_v33  ;;  %v1072_v43 = vadd.f32 %v1071_v28, %v4112_v12  ;;  %v3190_v46 = vpop.eup %3189  ;;  %v1306_v56 = vmul.f32 1.442695, %v1255_v0 }
 0x1a1   : > { %3195 = vpow2.f32 %v1300_v55  ;;  %v1172_v44 = vpop.f32.mrf.mxu0  ;;  %v1349_v20 = vadd.f32 1.0, %v3190_v46 }
 0x1a2   : > { %v3192_v45 = vpop.eup %3191  ;;  %3197 = vrcp.f32 %v1346_v29  ;;  %v1120_v3 = vpop.f32.mrf.mxu3  ;;  %v1173_v31 = vadd.f32 %v1172_v44, %v4109_v49 }
 0x1a3   : > { %v1411_v15 = vmul.f32 %v3192_v45, %v4200_v4  ;;  %3199 = vpow2.f32 %v1306_v56  ;;  %v4245_v6 = vadd.f32 %v1120_v3, %v1072_v43  ;;  %v3194_v9 = vpop.eup %3193  ;;  %v1221_v10 = vpop.f32.mrf.mxu1 }
 0x1a4   : > { %v4248_v38 = vadd.f32 %v1221_v10, %v1173_v31  ;;  %v1408_v33 = vmul.f32 %v3194_v9, %v4191_v18  ;;  %3201 = vrcp.f32 %v1349_v20 }
 0x1a5   : > { %v1254_v32 = vsub.f32 0.0, %v4245_v6  ;;  %v4254_v54 = vadd.f32 %v1411_v15, %v4001_v52 }
 0x1a6   : > { %v1257_v0 = vsub.f32 0.0, %v4248_v38  ;;  %v4266_v15 = vadd.f32 %v1408_v33, %v3987_v24 }
 0x1a7   : > { %v3196_v4 = vpop.eup %3195  ;;  %v1304_v55 = vmul.f32 1.442695, %v1254_v32  ;;  %v1074_v28 = vpop.f32.mrf.mxu2  ;;  %v1467_v29 = vpack.c.bf16 %v4254_v54, %v4251_v47 }
 0x1a8   : > { %v3198_v43 = vpop.eup %3197  ;;  %v1075_v25 = vadd.f32 %v1074_v28, %v4112_v12  ;;  %v1310_v1 = vmul.f32 1.442695, %v1257_v0  ;;  %v1348_v56 = vadd.f32 1.0, %v3196_v4 }
 0x1a9   : > { %v3200_v46 = vpop.eup %3199  ;;  %v1410_v52 = vmul.f32 %v3198_v43, %v4209_v22  ;;  %3203 = vpow2.f32 %v1304_v55  ;;  %1746 = vmatmul.bf16.gmra.mxu3 %v1467_v29  ;;  %1844 = vmatmul.bf16.gmra.mxu1 %v1467_v29  ;;  %v1174_v18 = vpop.f32.mrf.mxu0 }
 0x1aa   : > { %v1351_v44 = vadd.f32 1.0, %v3200_v46  ;;  %v1123_v45 = vpop.f32.mrf.mxu3  ;;  %v1175_v3 = vadd.f32 %v1174_v18, %v4109_v49  ;;  %3205 = vpow2.f32 %v1310_v1  ;;  %v3202_v32 = vpop.eup %3201 }
 0x1ab   : > { %v4263_v31 = vadd.f32 %v1123_v45, %v1075_v25  ;;  %v4269_v57 = vadd.f32 %v1410_v52, %v3990_v26  ;;  %v1223_v22 = vpop.f32.mrf.mxu1  ;;  %v1413_v28 = vmul.f32 %v3202_v32, %v4212_v62  ;;  %v2967_v32 = vld [vmem:[#allocation4 + $0x70] sm:$0xff] }
 0x1ac   : > { %3207 = vrcp.f32 %v1351_v44  ;;  %v4272_v20 = vadd.f32 %v1223_v22, %v1175_v3  ;;  %2292 = vmatpush.bf16.msra.mxu3 %v2967_v32 }
 0x1ad   : > { %v1256_v9 = vsub.f32 0.0, %v4263_v31  ;;  %v1466_v10 = vpack.c.bf16 %v4269_v57, %v4266_v15  ;;  %3209 = vrcp.f32 %v1348_v56  ;;  %v2959_v56 = vld [vmem:[#allocation4 + $0x30] sm:$0xff]  ;;  %v4284_v22 = vadd.f32 %v1413_v28, %v4025_v37 }
 0x1ae   : > { %v1259_v55 = vsub.f32 0.0, %v4272_v20  ;;  %2243 = vmatpush.bf16.msra.mxu2 %v2959_v56 }
 0x1af   : > { %v3204_v23 = vpop.eup %3203  ;;  %v1308_v4 = vmul.f32 1.442695, %v1256_v9  ;;  %1697 = vmatmul.bf16.gmra.mxu2 %v1466_v10  ;;  %1795 = vmatmul.bf16.gmra.mxu0 %v1466_v10  ;;  %v1076_v24 = vpop.f32.mrf.mxu2 }
 0x1b0   : > { %v1350_v26 = vadd.f32 1.0, %v3204_v23  ;;  %v1077_v33 = vadd.f32 %v1076_v24, %v4112_v12  ;;  %v3206_v0 = vpop.eup %3205  ;;  %v1314_v29 = vmul.f32 1.442695, %v1259_v55 }
 0x1b1   : > { %3211 = vpow2.f32 %v1308_v4  ;;  %v1177_v43 = vpop.f32.mrf.mxu0  ;;  %v1353_v45 = vadd.f32 1.0, %v3206_v0 }
 0x1b2   : > { %v3208_v25 = vpop.eup %3207  ;;  %3213 = vrcp.f32 %v1350_v26  ;;  %v1125_v46 = vpop.f32.mrf.mxu3  ;;  %v1178_v52 = vadd.f32 %v1177_v43, %v4109_v49 }
 0x1b3   : > { %v1415_v1 = vmul.f32 %v3208_v25, %v4236_v7  ;;  %3215 = vpow2.f32 %v1314_v29  ;;  %v4281_v18 = vadd.f32 %v1125_v46, %v1077_v33  ;;  %v3210_v44 = vpop.eup %3209  ;;  %v1226_v3 = vpop.f32.mrf.mxu1 }
 0x1b4   : > { %v4290_v10 = vadd.f32 %v1226_v3, %v1178_v52  ;;  %v1412_v23 = vmul.f32 %v3210_v44, %v4227_v50  ;;  %3217 = vrcp.f32 %v1353_v45 }
 0x1b5   : > { %v4287_v62 = vadd.f32 %v1415_v1, %v4033_v36  ;;  %v1258_v9 = vsub.f32 0.0, %v4281_v18 }
 0x1b6   : > { %v1261_v55 = vsub.f32 0.0, %v4290_v10  ;;  %v4300_v52 = vadd.f32 %v1412_v23, %v4019_v27 }
 0x1b7   : > { %v3212_v7 = vpop.eup %3211  ;;  %v1312_v4 = vmul.f32 1.442695, %v1258_v9  ;;  %v1079_v24 = vpop.f32.mrf.mxu2  ;;  %v1469_v37 = vpack.c.bf16 %v4287_v62, %v4284_v22 }
 0x1b8   : > { %v3214_v26 = vpop.eup %3213  ;;  %v1080_v36 = vadd.f32 %v1079_v24, %v4112_v12  ;;  %v1318_v28 = vmul.f32 1.442695, %v1261_v55  ;;  %v1352_v29 = vadd.f32 1.0, %v3212_v7 }
 0x1b9   : > { %v3216_v33 = vpop.eup %3215  ;;  %v1414_v0 = vmul.f32 %v3214_v26, %v4245_v6  ;;  %3219 = vpow2.f32 %v1312_v4  ;;  %1751 = vmatmul.bf16.gmra.mxu3 %v1469_v37  ;;  %1849 = vmatmul.bf16.gmra.mxu1 %v1469_v37  ;;  %v1179_v50 = vpop.f32.mrf.mxu0 }
 0x1ba   : > { %v1355_v43 = vadd.f32 1.0, %v3216_v33  ;;  %v1128_v25 = vpop.f32.mrf.mxu3  ;;  %v1180_v46 = vadd.f32 %v1179_v50, %v4109_v49  ;;  %3221 = vpow2.f32 %v1318_v28  ;;  %v3218_v9 = vpop.eup %3217 }
 0x1bb   : > { %v4303_v1 = vadd.f32 %v1414_v0, %v4022_v30  ;;  %v4305_v56 = vadd.f32 %v1128_v25, %v1080_v36  ;;  %v1228_v6 = vpop.f32.mrf.mxu1  ;;  %v1417_v24 = vmul.f32 %v3218_v9, %v4248_v38  ;;  %v2966_v9 = vld [vmem:[#allocation4 + $0x68] sm:$0xff] }
 0x1bc   : > { %3223 = vrcp.f32 %v1355_v43  ;;  %v4308_v45 = vadd.f32 %v1228_v6, %v1180_v46  ;;  %2293 = vmatpush.bf16.msra.mxu3 %v2966_v9  ;;  %v2964_v9 = vld [vmem:[#allocation4 + $0x58] sm:$0xff] }
 0x1bd   : > { %v1260_v44 = vsub.f32 0.0, %v4305_v56  ;;  %v1468_v3 = vpack.c.bf16 %v4303_v1, %v4300_v52  ;;  %3225 = vrcp.f32 %v1352_v29  ;;  %v2958_v29 = vld [vmem:[#allocation4 + $0x28] sm:$0xff]  ;;  %v4320_v6 = vadd.f32 %v1417_v24, %v4057_v60 }
 0x1be   : > { %v1263_v7 = vsub.f32 0.0, %v4308_v45  ;;  %2244 = vmatpush.bf16.msra.mxu2 %v2958_v29 }
 0x1bf   : > { %v3220_v32 = vpop.eup %3219  ;;  %v1316_v27 = vmul.f32 1.442695, %v1260_v44  ;;  %1702 = vmatmul.bf16.gmra.mxu2 %v1468_v3  ;;  %1800 = vmatmul.bf16.gmra.mxu0 %v1468_v3  ;;  %v1081_v30 = vpop.f32.mrf.mxu2 }
 0x1c0   : > { %v1354_v23 = vadd.f32 1.0, %v3220_v32  ;;  %v1082_v4 = vadd.f32 %v1081_v30, %v4112_v12  ;;  %v3222_v55 = vpop.eup %3221  ;;  %v1322_v37 = vmul.f32 1.442695, %v1263_v7 }
 0x1c1   : > { %3227 = vpow2.f32 %v1316_v27  ;;  %v1182_v26 = vpop.f32.mrf.mxu0  ;;  %v1357_v25 = vadd.f32 1.0, %v3222_v55 }
 0x1c2   : > { %v3224_v36 = vpop.eup %3223  ;;  %3229 = vrcp.f32 %v1354_v23  ;;  %v1130_v33 = vpop.f32.mrf.mxu3  ;;  %v1183_v0 = vadd.f32 %v1182_v26, %v4109_v49 }
 0x1c3   : > { %v1419_v28 = vmul.f32 %v3224_v36, %v4272_v20  ;;  %3231 = vpow2.f32 %v1322_v37  ;;  %v4317_v50 = vadd.f32 %v1130_v33, %v1082_v4  ;;  %v3226_v43 = vpop.eup %3225  ;;  %v1231_v46 = vpop.f32.mrf.mxu1 }
 0x1c4   : > { %v4326_v3 = vadd.f32 %v1231_v46, %v1183_v0  ;;  %v1416_v32 = vmul.f32 %v3226_v43, %v4263_v31  ;;  %3233 = vrcp.f32 %v1357_v25  ;;  %v2965_v43 = vld [vmem:[#allocation4 + $0x60] sm:$0xff] }
 0x1c5   : > { %v4323_v38 = vadd.f32 %v1419_v28, %v4065_v5  ;;  %v1262_v44 = vsub.f32 0.0, %v4317_v50  ;;  %2294 = vmatpush.bf16.msra.mxu3 %v2965_v43  ;;  %v2963_v43 = vld [vmem:[#allocation4 + $0x50] sm:$0xff] }
 0x1c6   : > { %v1265_v7 = vsub.f32 0.0, %v4326_v3  ;;  %v4336_v0 = vadd.f32 %v1416_v32, %v4051_v34  ;;  %v2956_v34 = vld [vmem:[#allocation4 + $0x18] sm:$0xff] }
 0x1c7   : > { %v3228_v20 = vpop.eup %3227  ;;  %v1320_v27 = vmul.f32 1.442695, %v1262_v44  ;;  %v1084_v30 = vpop.f32.mrf.mxu2  ;;  %v1471_v60 = vpack.c.bf16 %v4323_v38, %v4320_v6 }
 0x1c8   : > { %v3230_v23 = vpop.eup %3229  ;;  %v1085_v5 = vadd.f32 %v1084_v30, %v4112_v12  ;;  %v1326_v24 = vmul.f32 1.442695, %v1265_v7  ;;  %v1356_v37 = vadd.f32 1.0, %v3228_v20 }
 0x1c9   : > { %v3232_v4 = vpop.eup %3231  ;;  %v1418_v55 = vmul.f32 %v3230_v23, %v4281_v18  ;;  %3235 = vpow2.f32 %v1320_v27  ;;  %1756 = vmatmul.bf16.gmra.mxu3 %v1471_v60  ;;  %1854 = vmatmul.bf16.gmra.mxu1 %v1471_v60  ;;  %v1184_v31 = vpop.f32.mrf.mxu0  ;;  %v2957_v18 = vld [vmem:[#allocation4 + $0x20] sm:$0xff] }
 0x1ca   : > { %v1359_v26 = vadd.f32 1.0, %v3232_v4  ;;  %v1133_v36 = vpop.f32.mrf.mxu3  ;;  %v1185_v33 = vadd.f32 %v1184_v31, %v4109_v49  ;;  %3237 = vpow2.f32 %v1326_v24  ;;  %2245 = vmatpush.bf16.msra.mxu2 %v2957_v18  ;;  %2295 = vmatpush.bf16.msra.mxu3 %v2964_v9  ;;  %v2955_v18 = vld [vmem:[#allocation4 + $0x10] sm:$0xff] }
 0x1cb   : > { %v4339_v28 = vadd.f32 %v1418_v55, %v4054_v59  ;;  %v4341_v29 = vadd.f32 %v1133_v36, %v1085_v5  ;;  %v1233_v25 = vpop.f32.mrf.mxu1  ;;  %v3234_v59 = vpop.eup %3233 }
 0x1cc   : > { %3239 = vrcp.f32 %v1359_v26  ;;  %v4344_v44 = vadd.f32 %v1233_v25, %v1185_v33  ;;  %v1421_v5 = vmul.f32 %v3234_v59, %v4290_v10 }
 0x1cd   : > { %v1264_v46 = vsub.f32 0.0, %v4341_v29  ;;  %v1470_v49 = vpack.c.bf16 %v4339_v28, %v4336_v0  ;;  %3241 = vrcp.f32 %v1356_v37 }
 0x1ce   : > { %v1267_v27 = vsub.f32 0.0, %v4344_v44  ;;  %2246 = vmatpush.bf16.msra.mxu2 %v2956_v34  ;;  %v4353_v33 = vadd.f32 %v1421_v5, %v4083_v14  ;;  %2296 = vmatpush.bf16.msra.mxu3 %v2963_v43 }
 0x1cf   : > { %v3236_v20 = vpop.eup %3235  ;;  %v1324_v32 = vmul.f32 1.442695, %v1264_v46  ;;  %1707 = vmatmul.bf16.gmra.mxu2 %v1470_v49  ;;  %1805 = vmatmul.bf16.gmra.mxu0 %v1470_v49  ;;  %v1086_v7 = vpop.f32.mrf.mxu2 }
 0x1d0   : > { %v1358_v30 = vadd.f32 1.0, %v3236_v20  ;;  %v1087_v60 = vadd.f32 %v1086_v7, %v4112_v12  ;;  %v3238_v23 = vpop.eup %3237  ;;  %v1330_v4 = vmul.f32 1.442695, %v1267_v27 }
 0x1d1   : > { %3243 = vpow2.f32 %v1324_v32  ;;  %v1361_v36 = vadd.f32 1.0, %v3238_v23 }
 0x1d2   : > { %v3240_v55 = vpop.eup %3239  ;;  %3245 = vrcp.f32 %v1358_v30  ;;  %v1135_v24 = vpop.f32.mrf.mxu3  ;;  %2247 = vmatpush.bf16.msra.mxu2 %v2955_v18 }
 0x1d3   : > { %v1423_v31 = vmul.f32 %v3240_v55, %v4308_v45  ;;  %3247 = vpow2.f32 %v1330_v4  ;;  %v1136_v37 = vadd.f32 %v1135_v24, %v1087_v60  ;;  %v3242_v26 = vpop.eup %3241 }
 0x1d4   : > { %v1420_v46 = vmul.f32 %v3242_v26, %v4305_v56  ;;  %3249 = vrcp.f32 %v1361_v36 }
 0x1d5   : > { %v4356_v12 = vadd.f32 %v1423_v31, %v4088_v16  ;;  %v1266_v10 = vsub.f32 0.0, %v1136_v37 }
 0x1d6   : > { %v4363_v20 = vadd.f32 %v1420_v46, %v4077_v11 }
 0x1d7   : > { %v3244_v25 = vpop.eup %3243  ;;  %v1328_v49 = vmul.f32 1.442695, %v1266_v10  ;;  %v1473_v45 = vpack.c.bf16 %v4356_v12, %v4353_v33  ;;  %v2962_v10 = vld [vmem:[#allocation4 + $0x48] sm:$0xff] }
 0x1d8   : > { %v3246_v34 = vpop.eup %3245  ;;  %v1360_v16 = vadd.f32 1.0, %v3244_v25  ;;  %2297 = vmatpush.bf16.msra.mxu3 %v2962_v10  ;;  %v2961_v25 = vld [vmem:[#allocation4 + $0x40] sm:$0xff] }
 0x1d9   : > { %v3248_v9 = vpop.eup %3247  ;;  %v1422_v14 = vmul.f32 %v3246_v34, %v4317_v50  ;;  %3251 = vpow2.f32 %v1328_v49  ;;  %1761 = vmatmul.bf16.gmra.mxu3 %v1473_v45  ;;  %1859 = vmatmul.bf16.gmra.mxu1 %v1473_v45  ;;  %v2954_v49 = vld [vmem:[#allocation4 + $0x8] sm:$0xff] }
 0x1da   : > { %v1363_v59 = vadd.f32 1.0, %v3248_v9  ;;  %v3250_v27 = vpop.eup %3249  ;;  %2248 = vmatpush.bf16.msra.mxu2 %v2954_v49 }
 0x1db   : > { %v4366_v56 = vadd.f32 %v1422_v14, %v4080_v13  ;;  %v1425_v30 = vmul.f32 %v3250_v27, %v4326_v3 }
 0x1dc   : > { %3253 = vrcp.f32 %v1363_v59  ;;  %2298 = vmatpush.bf16.msra.mxu3 %v2961_v25 }
 0x1dd   : > { %v1472_v32 = vpack.c.bf16 %v4366_v56, %v4363_v20  ;;  %3255 = vrcp.f32 %v1360_v16  ;;  %v4373_v13 = vadd.f32 %v1425_v30, %v4098_v41 }
 0x1df   : > { %v3252_v7 = vpop.eup %3251  ;;  %1712 = vmatmul.bf16.gmra.mxu2 %v1472_v32  ;;  %1810 = vmatmul.bf16.gmra.mxu0 %v1472_v32 }
 0x1e0   : > { %v1362_v50 = vadd.f32 1.0, %v3252_v7  ;;  %v2953_v7 = vld [vmem:[#allocation4] sm:$0xff] }
 0x1e1   : > { %2249 = vmatpush.bf16.msra.mxu2 %v2953_v7 }
 0x1e2   : > { %v3254_v60 = vpop.eup %3253  ;;  %3257 = vrcp.f32 %v1362_v50 }
 0x1e3   : > { %v1427_v11 = vmul.f32 %v3254_v60, %v4344_v44  ;;  %v3256_v23 = vpop.eup %3255 }
 0x1e4   : > { %v1424_v4 = vmul.f32 %v3256_v23, %v4341_v29  ;;  %v1508_v29 = vld [vmem:[%s4624_s6] sm:$0x3] }
 0x1e5   : > { %v4376_v5 = vadd.f32 %v1427_v11, %v4102_v42  ;;  %v4392_v26 = vperm.slane %v1508_v29, 1  ;;  %v4397_v43 = vperm.slane %v1508_v29, 0 }
 0x1e6   : > { %v4382_v3 = vadd.f32 %v1424_v4, %v4093_v39 }
 0x1e7   : > { %v1475_v55 = vpack.c.bf16 %v4376_v5, %v4373_v13 }
 0x1e8   : > { %v3258_v24 = vpop.eup %3257 }
 0x1e9   : > { %v1426_v31 = vmul.f32 %v3258_v24, %v1136_v37  ;;  %1766 = vmatmul.bf16.gmra.mxu3 %v1475_v55  ;;  %1864 = vmatmul.bf16.gmra.mxu1 %v1475_v55 }
 0x1eb   : > { %v4385_v44 = vadd.f32 %v1426_v31, %v4095_v19 }
 0x1ed   : > { %v1474_v41 = vpack.c.bf16 %v4385_v44, %v4382_v3 }
 0x1ef   : > { %1717 = vmatmul.bf16.gmra.mxu2 %v1474_v41  ;;  %1815 = vmatmul.bf16.gmra.mxu0 %v1474_v41 }
 0x1f5   : > { %v1830_v42 = vpop.f32.mrf.mxu1 }
 0x1fb   : > { %v1732_v37 = vpop.f32.mrf.mxu3  ;;  %v1781_v36 = vpop.f32.mrf.mxu0 }
 0x1fc   : > { %v1782_v39 = vadd.f32 %v1781_v36, %v4392_v26 }
 0x1fd   : > { %v1832_v18 = vpop.f32.mrf.mxu1 }
 0x1fe   : > { %v4395_v19 = vadd.f32 %v1830_v42, %v1782_v39 }
 0x200   : > { %v1871_v46 = vsub.f32 0.0, %v4395_v19 }
 0x201   : > { %v1683_v45 = vpop.f32.mrf.mxu2 }
 0x202   : > { %v1904_v34 = vmul.f32 1.442695, %v1871_v46  ;;  %v1684_v9 = vadd.f32 %v1683_v45, %v4397_v43 }
 0x203   : > { %v1734_v14 = vpop.f32.mrf.mxu3  ;;  %v1783_v16 = vpop.f32.mrf.mxu0 }
 0x204   : > { %3259 = vpow2.f32 %v1904_v34  ;;  %v4401_v59 = vadd.f32 %v1732_v37, %v1684_v9  ;;  %v1784_v32 = vadd.f32 %v1783_v16, %v4392_v26 }
 0x205   : > { %v1835_v27 = vpop.f32.mrf.mxu1 }
 0x206   : > { %v1870_v50 = vsub.f32 0.0, %v4401_v59  ;;  %v1833_v30 = vadd.f32 %v1832_v18, %v1784_v32 }
 0x208   : > { %v1902_v60 = vmul.f32 1.442695, %v1870_v50  ;;  %v1873_v11 = vsub.f32 0.0, %v1833_v30 }
 0x209   : > { %v1685_v23 = vpop.f32.mrf.mxu2 }
 0x20a   : > { %v3260_v4 = vpop.eup %3259  ;;  %3261 = vpow2.f32 %v1902_v60  ;;  %v1908_v55 = vmul.f32 1.442695, %v1873_v11  ;;  %v1686_v24 = vadd.f32 %v1685_v23, %v4397_v43 }
 0x20b   : > { %v1737_v31 = vpop.f32.mrf.mxu3  ;;  %v1967_v37 = vadd.f32 1.0, %v3260_v4 }
 0x20c   : > { %v1786_v41 = vpop.f32.mrf.mxu0  ;;  %3263 = vpow2.f32 %v1908_v55  ;;  %v4406_v42 = vadd.f32 %v1734_v14, %v1686_v24 }
 0x20d   : > { %v1787_v29 = vadd.f32 %v1786_v41, %v4392_v26  ;;  %v1837_v36 = vpop.f32.mrf.mxu1  ;;  %3265 = vrcp.f32 %v1967_v37 }
 0x20e   : > { %v1872_v10 = vsub.f32 0.0, %v4406_v42 }
 0x20f   : > { %v4410_v39 = vadd.f32 %v1835_v27, %v1787_v29 }
 0x210   : > { %v3262_v18 = vpop.eup %3261  ;;  %v1906_v25 = vmul.f32 1.442695, %v1872_v10 }
 0x211   : > { %v1875_v46 = vsub.f32 0.0, %v4410_v39  ;;  %v1966_v34 = vadd.f32 1.0, %v3262_v18 }
 0x212   : > { %v1688_v49 = vpop.f32.mrf.mxu2  ;;  %v3264_v45 = vpop.eup %3263  ;;  %3267 = vpow2.f32 %v1906_v25 }
 0x213   : > { %v1912_v9 = vmul.f32 1.442695, %v1875_v46  ;;  %v1689_v14 = vadd.f32 %v1688_v49, %v4397_v43  ;;  %v1969_v16 = vadd.f32 1.0, %v3264_v45  ;;  %v1739_v32 = vpop.f32.mrf.mxu3  ;;  %v3266_v4 = vpop.eup %3265 }
 0x214   : > { %v1788_v7 = vpop.f32.mrf.mxu0 }
 0x215   : > { %3269 = vpow2.f32 %v1912_v9  ;;  %v4414_v50 = vadd.f32 %v1737_v31, %v1689_v14  ;;  %v1789_v27 = vadd.f32 %v1788_v7, %v4392_v26  ;;  %v2031_v31 = vmul.f32 %v3266_v4, %v4395_v19 }
 0x216   : > { %3271 = vrcp.f32 %v1969_v16  ;;  %v1840_v60 = vpop.f32.mrf.mxu1 }
 0x217   : > { %3273 = vrcp.f32 %v1966_v34  ;;  %v1874_v11 = vsub.f32 0.0, %v4414_v50  ;;  %v4418_v23 = vadd.f32 %v1837_v36, %v1789_v27  ;;  %v2063_v27 = vadd.f32 %v2031_v31, %v4141_v51 }
 0x218   : > { %v3268_v55 = vpop.eup %3267 }
 0x219   : > { %v1910_v24 = vmul.f32 1.442695, %v1874_v11  ;;  %v1877_v41 = vsub.f32 0.0, %v4418_v23  ;;  %v1968_v29 = vadd.f32 1.0, %v3268_v55 }
 0x21a   : > { %v1690_v37 = vpop.f32.mrf.mxu2 }
 0x21b   : > { %v3270_v10 = vpop.eup %3269  ;;  %3275 = vpow2.f32 %v1910_v24  ;;  %v1916_v18 = vmul.f32 1.442695, %v1877_v41  ;;  %v1691_v25 = vadd.f32 %v1690_v37, %v4397_v43 }
 0x21c   : > { %v3272_v46 = vpop.eup %3271  ;;  %3277 = vrcp.f32 %v1968_v29  ;;  %v1742_v49 = vpop.f32.mrf.mxu3  ;;  %v1971_v14 = vadd.f32 1.0, %v3270_v10 }
 0x21d   : > { %v1791_v45 = vpop.f32.mrf.mxu0  ;;  %v3274_v36 = vpop.eup %3273  ;;  %v2033_v34 = vmul.f32 %v3272_v46, %v1833_v30  ;;  %3279 = vpow2.f32 %v1916_v18  ;;  %v4423_v9 = vadd.f32 %v1739_v32, %v1691_v25 }
 0x21e   : > { %v1792_v16 = vadd.f32 %v1791_v45, %v4392_v26  ;;  %v1842_v7 = vpop.f32.mrf.mxu1  ;;  %v2030_v4 = vmul.f32 %v3274_v36, %v4401_v59  ;;  %3281 = vrcp.f32 %v1971_v14 }
 0x21f   : > { %v2065_v19 = vadd.f32 %v2033_v34, %v4144_v58  ;;  %v1876_v11 = vsub.f32 0.0, %v4423_v9 }
 0x220   : > { %v4430_v55 = vadd.f32 %v1840_v60, %v1792_v16  ;;  %v2062_v59 = vadd.f32 %v2030_v4, %v4156_v2 }
 0x221   : > { %v3276_v24 = vpop.eup %3275  ;;  %v2095_v41 = vpack.c.bf16 %v2065_v19, %v2063_v27  ;;  %v1914_v30 = vmul.f32 1.442695, %v1876_v11 }
 0x222   : > { %v3278_v29 = vpop.eup %3277  ;;  %v1970_v32 = vadd.f32 1.0, %v3276_v24  ;;  %v1879_v37 = vsub.f32 0.0, %v4430_v55  ;;  %v1693_v10 = vpop.f32.mrf.mxu2 }
 0x223   : > { %v3280_v18 = vpop.eup %3279  ;;  %v2032_v51 = vmul.f32 %v3278_v29, %v4406_v42  ;;  %3283 = vpow2.f32 %v1914_v30  ;;  %v1694_v58 = vadd.f32 %v1693_v10, %v4397_v43  ;;  %2299 = vmatmul.bf16.vlgmr.msra.gmra.mxu3 %v2095_v41 }
 0x224   : > { %v1973_v60 = vadd.f32 1.0, %v3280_v18  ;;  %v1920_v31 = vmul.f32 1.442695, %v1879_v37  ;;  %v1744_v25 = vpop.f32.mrf.mxu3  ;;  %3285 = vrcp.f32 %v1970_v32  ;;  %v3282_v2 = vpop.eup %3281 }
 0x225   : > { %v1793_v46 = vpop.f32.mrf.mxu0  ;;  %v2064_v45 = vadd.f32 %v2032_v51, %v4159_v53  ;;  %v4437_v36 = vadd.f32 %v1742_v49, %v1694_v58  ;;  %v2035_v41 = vmul.f32 %v3282_v2, %v4410_v39 }
 0x226   : > { %v1794_v34 = vadd.f32 %v1793_v46, %v4392_v26  ;;  %3287 = vrcp.f32 %v1973_v60  ;;  %v1845_v14 = vpop.f32.mrf.mxu1 }
 0x227   : > { %v2094_v42 = vpack.c.bf16 %v2064_v45, %v2062_v59  ;;  %3289 = vpow2.f32 %v1920_v31  ;;  %v1878_v16 = vsub.f32 0.0, %v4437_v36  ;;  %v2067_v46 = vadd.f32 %v2035_v41, %v4179_v35 }
 0x228   : > { %v4441_v27 = vadd.f32 %v1842_v7, %v1794_v34 }
 0x229   : > { %v3284_v19 = vpop.eup %3283  ;;  %v1918_v11 = vmul.f32 1.442695, %v1878_v16  ;;  %2250 = vmatmul.bf16.vlgmr.msra.gmra.mxu2 %v2094_v42 }
 0x22a   : > { %v1881_v4 = vsub.f32 0.0, %v4441_v27  ;;  %v1972_v53 = vadd.f32 1.0, %v3284_v19  ;;  %v1695_v24 = vpop.f32.mrf.mxu2  ;;  %v3286_v49 = vpop.eup %3285 }
 0x22b   : > { %3291 = vpow2.f32 %v1918_v11  ;;  %v1696_v29 = vadd.f32 %v1695_v24, %v4397_v43  ;;  %v2034_v34 = vmul.f32 %v3286_v49, %v4414_v50 }
 0x22c   : > { %v1924_v30 = vmul.f32 1.442695, %v1881_v4  ;;  %v3288_v32 = vpop.eup %3287  ;;  %3293 = vrcp.f32 %v1972_v53  ;;  %v1747_v37 = vpop.f32.mrf.mxu3 }
 0x22d   : > { %v1796_v7 = vpop.f32.mrf.mxu0  ;;  %v3290_v10 = vpop.eup %3289  ;;  %v2037_v18 = vmul.f32 %v3288_v32, %v4418_v23  ;;  %v4447_v51 = vadd.f32 %v1744_v25, %v1696_v29  ;;  %v2066_v49 = vadd.f32 %v2034_v34, %v4194_v21 }
 0x22e   : > { %3295 = vpow2.f32 %v1924_v30  ;;  %v1797_v58 = vadd.f32 %v1796_v7, %v4392_v26  ;;  %v1975_v59 = vadd.f32 1.0, %v3290_v10  ;;  %v1847_v60 = vpop.f32.mrf.mxu1 }
 0x22f   : > { %v1880_v39 = vsub.f32 0.0, %v4447_v51  ;;  %v2069_v45 = vadd.f32 %v2037_v18, %v4182_v61 }
 0x230   : > { %v4451_v31 = vadd.f32 %v1845_v14, %v1797_v58  ;;  %3297 = vrcp.f32 %v1975_v59 }
 0x231   : > { %v3292_v42 = vpop.eup %3291  ;;  %v1922_v16 = vmul.f32 1.442695, %v1880_v39  ;;  %v2097_v25 = vpack.c.bf16 %v2069_v45, %v2067_v46 }
 0x232   : > { %v1883_v23 = vsub.f32 0.0, %v4451_v31  ;;  %v3294_v2 = vpop.eup %3293  ;;  %v1698_v19 = vpop.f32.mrf.mxu2  ;;  %v1974_v35 = vadd.f32 1.0, %v3292_v42 }
 0x233   : > { %v2036_v4 = vmul.f32 %v3294_v2, %v4423_v9  ;;  %3299 = vpow2.f32 %v1922_v16  ;;  %v1699_v53 = vadd.f32 %v1698_v19, %v4397_v43  ;;  %2304 = vmatmul.bf16.gmra.mxu3 %v2097_v25 }
 0x234   : > { %v3296_v11 = vpop.eup %3295  ;;  %v1928_v14 = vmul.f32 1.442695, %v1883_v23  ;;  %v1749_v24 = vpop.f32.mrf.mxu3 }
 0x235   : > { %v1977_v61 = vadd.f32 1.0, %v3296_v11  ;;  %v1798_v50 = vpop.f32.mrf.mxu0  ;;  %v4460_v41 = vadd.f32 %v1747_v37, %v1699_v53  ;;  %v2068_v29 = vadd.f32 %v2036_v4, %v4197_v63 }
 0x236   : > { %3301 = vpow2.f32 %v1928_v14  ;;  %v1799_v30 = vadd.f32 %v1798_v50, %v4392_v26  ;;  %v1850_v9 = vpop.f32.mrf.mxu1  ;;  %v3298_v18 = vpop.eup %3297 }
 0x237   : > { %3303 = vrcp.f32 %v1977_v61  ;;  %v1882_v32 = vsub.f32 0.0, %v4460_v41  ;;  %v2096_v10 = vpack.c.bf16 %v2068_v29, %v2066_v49  ;;  %v2039_v45 = vmul.f32 %v3298_v18, %v4430_v55 }
 0x238   : > { %v4465_v7 = vadd.f32 %v1847_v60, %v1799_v30  ;;  %3305 = vrcp.f32 %v1974_v35 }
 0x239   : > { %v3300_v58 = vpop.eup %3299  ;;  %v1926_v59 = vmul.f32 1.442695, %v1882_v32  ;;  %2255 = vmatmul.bf16.gmra.mxu2 %v2096_v10  ;;  %v2071_v53 = vadd.f32 %v2039_v45, %v4215_v17 }
 0x23a   : > { %v1885_v21 = vsub.f32 0.0, %v4465_v7  ;;  %v1976_v37 = vadd.f32 1.0, %v3300_v58  ;;  %v1700_v39 = vpop.f32.mrf.mxu2 }
 0x23b   : > { %3307 = vpow2.f32 %v1926_v59  ;;  %v1701_v34 = vadd.f32 %v1700_v39, %v4397_v43 }
 0x23c   : > { %v3302_v46 = vpop.eup %3301  ;;  %v1932_v63 = vmul.f32 1.442695, %v1885_v21  ;;  %3309 = vrcp.f32 %v1976_v37  ;;  %v1752_v60 = vpop.f32.mrf.mxu3 }
 0x23d   : > { %v3304_v42 = vpop.eup %3303  ;;  %v1801_v16 = vpop.f32.mrf.mxu0  ;;  %v4471_v25 = vadd.f32 %v1749_v24, %v1701_v34  ;;  %v1979_v19 = vadd.f32 1.0, %v3302_v46 }
 0x23e   : > { %v2041_v23 = vmul.f32 %v3304_v42, %v4441_v27  ;;  %3311 = vpow2.f32 %v1932_v63  ;;  %v1802_v2 = vadd.f32 %v1801_v16, %v4392_v26  ;;  %v1852_v11 = vpop.f32.mrf.mxu1  ;;  %v3306_v4 = vpop.eup %3305 }
 0x23f   : > { %v1884_v55 = vsub.f32 0.0, %v4471_v25  ;;  %v2038_v30 = vmul.f32 %v3306_v4, %v4437_v36  ;;  %3313 = vrcp.f32 %v1979_v19 }
 0x240   : > { %v4475_v14 = vadd.f32 %v1850_v9, %v1802_v2  ;;  %v2073_v35 = vadd.f32 %v2041_v23, %v4218_v40 }
 0x241   : > { %v3308_v61 = vpop.eup %3307  ;;  %v1930_v50 = vmul.f32 1.442695, %v1884_v55  ;;  %v2070_v39 = vadd.f32 %v2038_v30, %v4230_v8 }
 0x242   : > { %v1887_v27 = vsub.f32 0.0, %v4475_v14  ;;  %v2099_v49 = vpack.c.bf16 %v2073_v35, %v2071_v53  ;;  %v3310_v24 = vpop.eup %3309  ;;  %v1703_v29 = vpop.f32.mrf.mxu2  ;;  %v1978_v59 = vadd.f32 1.0, %v3308_v61 }
 0x243   : > { %v2040_v10 = vmul.f32 %v3310_v24, %v4447_v51  ;;  %3315 = vpow2.f32 %v1930_v50  ;;  %v1704_v18 = vadd.f32 %v1703_v29, %v4397_v43 }
 0x244   : > { %v3312_v32 = vpop.eup %3311  ;;  %v1936_v9 = vmul.f32 1.442695, %v1887_v27  ;;  %2309 = vmatmul.bf16.gmra.mxu3 %v2099_v49  ;;  %v1754_v40 = vpop.f32.mrf.mxu3 }
 0x245   : > { %v1981_v17 = vadd.f32 1.0, %v3312_v32  ;;  %v1803_v58 = vpop.f32.mrf.mxu0  ;;  %v4483_v21 = vadd.f32 %v1752_v60, %v1704_v18  ;;  %v2072_v51 = vadd.f32 %v2040_v10, %v4233_v48  ;;  %v3314_v63 = vpop.eup %3313 }
 0x246   : > { %3317 = vpow2.f32 %v1936_v9  ;;  %v1804_v37 = vadd.f32 %v1803_v58, %v4392_v26  ;;  %v1855_v36 = vpop.f32.mrf.mxu1  ;;  %v2043_v4 = vmul.f32 %v3314_v63, %v4451_v31 }
 0x247   : > { %3319 = vrcp.f32 %v1981_v17  ;;  %v1886_v46 = vsub.f32 0.0, %v4483_v21  ;;  %v2098_v34 = vpack.c.bf16 %v2072_v51, %v2070_v39 }
 0x248   : > { %v4489_v45 = vadd.f32 %v1852_v11, %v1804_v37  ;;  %3321 = vrcp.f32 %v1978_v59  ;;  %v2075_v29 = vadd.f32 %v2043_v4, %v4251_v47 }
 0x249   : > { %v3316_v42 = vpop.eup %3315  ;;  %v1934_v16 = vmul.f32 1.442695, %v1886_v46  ;;  %2260 = vmatmul.bf16.gmra.mxu2 %v2098_v34 }
 0x24a   : > { %v1889_v60 = vsub.f32 0.0, %v4489_v45  ;;  %v1980_v23 = vadd.f32 1.0, %v3316_v42  ;;  %v1705_v2 = vpop.f32.mrf.mxu2 }
 0x24b   : > { %3323 = vpow2.f32 %v1934_v16  ;;  %v1706_v48 = vadd.f32 %v1705_v2, %v4397_v43 }
 0x24c   : > { %v3318_v19 = vpop.eup %3317  ;;  %v1940_v8 = vmul.f32 1.442695, %v1889_v60  ;;  %3325 = vrcp.f32 %v1980_v23  ;;  %v1757_v11 = vpop.f32.mrf.mxu3 }
 0x24d   : > { %v3320_v55 = vpop.eup %3319  ;;  %v1806_v53 = vpop.f32.mrf.mxu0  ;;  %v4495_v61 = vadd.f32 %v1754_v40, %v1706_v48  ;;  %v1983_v27 = vadd.f32 1.0, %v3318_v19 }
 0x24e   : > { %v2045_v35 = vmul.f32 %v3320_v55, %v4465_v7  ;;  %3327 = vpow2.f32 %v1940_v8  ;;  %v1807_v50 = vadd.f32 %v1806_v53, %v4392_v26  ;;  %v1857_v49 = vpop.f32.mrf.mxu1  ;;  %v3322_v24 = vpop.eup %3321 }
 0x24f   : > { %v1888_v31 = vsub.f32 0.0, %v4495_v61  ;;  %v2042_v40 = vmul.f32 %v3322_v24, %v4460_v41  ;;  %3329 = vrcp.f32 %v1983_v27 }
 0x250   : > { %v4499_v30 = vadd.f32 %v1855_v36, %v1807_v50  ;;  %v2077_v32 = vadd.f32 %v2045_v35, %v4254_v54 }
 0x251   : > { %v3324_v10 = vpop.eup %3323  ;;  %v1938_v9 = vmul.f32 1.442695, %v1888_v31  ;;  %v2074_v41 = vadd.f32 %v2042_v40, %v4266_v15 }
 0x252   : > { %v1891_v7 = vsub.f32 0.0, %v4499_v30  ;;  %v2101_v18 = vpack.c.bf16 %v2077_v32, %v2075_v29  ;;  %v3326_v17 = vpop.eup %3325  ;;  %v1708_v58 = vpop.f32.mrf.mxu2  ;;  %v1982_v46 = vadd.f32 1.0, %v3324_v10 }
 0x253   : > { %v2044_v37 = vmul.f32 %v3326_v17, %v4471_v25  ;;  %3331 = vpow2.f32 %v1938_v9  ;;  %v1709_v39 = vadd.f32 %v1708_v58, %v4397_v43 }
 0x254   : > { %v3328_v59 = vpop.eup %3327  ;;  %v1944_v36 = vmul.f32 1.442695, %v1891_v7  ;;  %2314 = vmatmul.bf16.gmra.mxu3 %v2101_v18  ;;  %v1759_v54 = vpop.f32.mrf.mxu3 }
 0x255   : > { %v1985_v47 = vadd.f32 1.0, %v3328_v59  ;;  %v1808_v51 = vpop.f32.mrf.mxu0  ;;  %v4507_v63 = vadd.f32 %v1757_v11, %v1709_v39  ;;  %v2076_v42 = vadd.f32 %v2044_v37, %v4269_v57  ;;  %v3330_v60 = vpop.eup %3329 }
 0x256   : > { %3333 = vpow2.f32 %v1944_v36  ;;  %v1809_v34 = vadd.f32 %v1808_v51, %v4392_v26  ;;  %v1860_v23 = vpop.f32.mrf.mxu1  ;;  %v2047_v15 = vmul.f32 %v3330_v60, %v4475_v14 }
 0x257   : > { %3335 = vrcp.f32 %v1985_v47  ;;  %v1890_v25 = vsub.f32 0.0, %v4507_v63  ;;  %v2100_v2 = vpack.c.bf16 %v2076_v42, %v2074_v41 }
 0x258   : > { %v4513_v16 = vadd.f32 %v1857_v49, %v1809_v34  ;;  %3337 = vrcp.f32 %v1982_v46  ;;  %v2079_v9 = vadd.f32 %v2047_v15, %v4284_v22 }
 0x259   : > { %v3332_v19 = vpop.eup %3331  ;;  %v1942_v4 = vmul.f32 1.442695, %v1890_v25  ;;  %2265 = vmatmul.bf16.gmra.mxu2 %v2100_v2 }
 0x25a   : > { %v1893_v8 = vsub.f32 0.0, %v4513_v16  ;;  %v1984_v48 = vadd.f32 1.0, %v3332_v19  ;;  %v1710_v55 = vpop.f32.mrf.mxu2 }
 0x25b   : > { %3339 = vpow2.f32 %v1942_v4  ;;  %v1711_v53 = vadd.f32 %v1710_v55, %v4397_v43 }
 0x25c   : > { %v3334_v11 = vpop.eup %3333  ;;  %v1948_v57 = vmul.f32 1.442695, %v1893_v8  ;;  %3341 = vrcp.f32 %v1984_v48  ;;  %v1762_v29 = vpop.f32.mrf.mxu3 }
 0x25d   : > { %v3336_v35 = vpop.eup %3335  ;;  %v1811_v50 = vpop.f32.mrf.mxu0  ;;  %v4519_v49 = vadd.f32 %v1759_v54, %v1711_v53  ;;  %v1987_v31 = vadd.f32 1.0, %v3334_v11 }
 0x25e   : > { %v2049_v27 = vmul.f32 %v3336_v35, %v4489_v45  ;;  %3343 = vpow2.f32 %v1948_v57  ;;  %v1812_v24 = vadd.f32 %v1811_v50, %v4392_v26  ;;  %v3338_v32 = vpop.eup %3337  ;;  %v1862_v37 = vpop.f32.mrf.mxu1 }
 0x25f   : > { %v1892_v10 = vsub.f32 0.0, %v4519_v49  ;;  %v2046_v59 = vmul.f32 %v3338_v32, %v4483_v21  ;;  %3345 = vrcp.f32 %v1987_v31 }
 0x260   : > { %v4523_v14 = vadd.f32 %v1860_v23, %v1812_v24  ;;  %v2081_v7 = vadd.f32 %v2049_v27, %v4287_v62 }
 0x261   : > { %v3340_v18 = vpop.eup %3339  ;;  %v1946_v17 = vmul.f32 1.442695, %v1892_v10  ;;  %v2078_v21 = vadd.f32 %v2046_v59, %v4300_v52 }
 0x262   : > { %v1895_v45 = vsub.f32 0.0, %v4523_v14  ;;  %v2103_v40 = vpack.c.bf16 %v2081_v7, %v2079_v9  ;;  %v3342_v58 = vpop.eup %3341  ;;  %v1713_v36 = vpop.f32.mrf.mxu2  ;;  %v1986_v46 = vadd.f32 1.0, %v3340_v18 }
 0x263   : > { %v2048_v47 = vmul.f32 %v3342_v58, %v4495_v61  ;;  %3347 = vpow2.f32 %v1946_v17  ;;  %v1714_v22 = vadd.f32 %v1713_v36, %v4397_v43 }
 0x264   : > { %v3344_v39 = vpop.eup %3343  ;;  %v1952_v54 = vmul.f32 1.442695, %v1895_v45  ;;  %2319 = vmatmul.bf16.gmra.mxu3 %v2103_v40  ;;  %v1764_v23 = vpop.f32.mrf.mxu3 }
 0x265   : > { %v1989_v62 = vadd.f32 1.0, %v3344_v39  ;;  %v1813_v51 = vpop.f32.mrf.mxu0  ;;  %v4531_v34 = vadd.f32 %v1762_v29, %v1714_v22  ;;  %v2080_v42 = vadd.f32 %v2048_v47, %v4303_v1  ;;  %v3346_v60 = vpop.eup %3345 }
 0x266   : > { %3349 = vpow2.f32 %v1952_v54  ;;  %v1814_v41 = vadd.f32 %v1813_v51, %v4392_v26  ;;  %v2051_v52 = vmul.f32 %v3346_v60, %v4499_v30  ;;  %v1865_v53 = vpop.f32.mrf.mxu1 }
 0x267   : > { %3351 = vrcp.f32 %v1989_v62  ;;  %v1894_v61 = vsub.f32 0.0, %v4531_v34  ;;  %v2102_v2 = vpack.c.bf16 %v2080_v42, %v2078_v21 }
 0x268   : > { %v4537_v25 = vadd.f32 %v1862_v37, %v1814_v41  ;;  %3353 = vrcp.f32 %v1986_v46  ;;  %v2083_v10 = vadd.f32 %v2051_v52, %v4320_v6 }
 0x269   : > { %v3348_v19 = vpop.eup %3347  ;;  %v1950_v4 = vmul.f32 1.442695, %v1894_v61  ;;  %2270 = vmatmul.bf16.gmra.mxu2 %v2102_v2 }
 0x26a   : > { %v1897_v8 = vsub.f32 0.0, %v4537_v25  ;;  %v1988_v48 = vadd.f32 1.0, %v3348_v19  ;;  %v1715_v55 = vpop.f32.mrf.mxu2 }
 0x26b   : > { %3355 = vpow2.f32 %v1950_v4  ;;  %v1716_v15 = vadd.f32 %v1715_v55, %v4397_v43 }
 0x26c   : > { %v3350_v11 = vpop.eup %3349  ;;  %v1956_v1 = vmul.f32 1.442695, %v1897_v8  ;;  %3357 = vrcp.f32 %v1988_v48  ;;  %v1767_v58 = vpop.f32.mrf.mxu3 }
 0x26d   : > { %v3352_v57 = vpop.eup %3351  ;;  %v1816_v35 = vpop.f32.mrf.mxu0  ;;  %v4543_v27 = vadd.f32 %v1764_v23, %v1716_v15  ;;  %v1991_v31 = vadd.f32 1.0, %v3350_v11 }
 0x26e   : > { %v2053_v50 = vmul.f32 %v3352_v57, %v4513_v16  ;;  %3359 = vpow2.f32 %v1956_v1  ;;  %v1817_v24 = vadd.f32 %v1816_v35, %v4392_v26  ;;  %v3354_v29 = vpop.eup %3353 }
 0x26f   : > { %v1896_v32 = vsub.f32 0.0, %v4543_v27  ;;  %v2050_v40 = vmul.f32 %v3354_v29, %v4507_v63  ;;  %3361 = vrcp.f32 %v1991_v31  ;;  %v1867_v63 = vpop.f32.mrf.mxu1 }
 0x270   : > { %v4547_v30 = vadd.f32 %v1865_v53, %v1817_v24  ;;  %v2085_v9 = vadd.f32 %v2053_v50, %v4323_v38 }
 0x271   : > { %v3356_v7 = vpop.eup %3355  ;;  %v1954_v18 = vmul.f32 1.442695, %v1896_v32  ;;  %v2082_v51 = vadd.f32 %v2050_v40, %v4336_v0 }
 0x272   : > { %v1899_v17 = vsub.f32 0.0, %v4547_v30  ;;  %v2105_v16 = vpack.c.bf16 %v2085_v9, %v2083_v10  ;;  %v3358_v45 = vpop.eup %3357  ;;  %v1718_v59 = vpop.f32.mrf.mxu2  ;;  %v1990_v38 = vadd.f32 1.0, %v3356_v7 }
 0x273   : > { %v2052_v36 = vmul.f32 %v3358_v45, %v4519_v49  ;;  %3363 = vpow2.f32 %v1954_v18  ;;  %v1719_v6 = vadd.f32 %v1718_v59, %v4397_v43 }
 0x274   : > { %v3360_v37 = vpop.eup %3359  ;;  %v1960_v39 = vmul.f32 1.442695, %v1899_v17  ;;  %2324 = vmatmul.bf16.gmra.mxu3 %v2105_v16 }
 0x275   : > { %v1993_v47 = vadd.f32 1.0, %v3360_v37  ;;  %v1818_v54 = vpop.f32.mrf.mxu0  ;;  %v1768_v22 = vadd.f32 %v1767_v58, %v1719_v6  ;;  %v2084_v46 = vadd.f32 %v2052_v36, %v4339_v28  ;;  %v3362_v21 = vpop.eup %3361  ;;  %v4575_v6 = vld [vmem:[%s4626_s8] ss:$0 sm:$0xff] }
 0x276   : > { %3365 = vpow2.f32 %v1960_v39  ;;  %v1819_v62 = vadd.f32 %v1818_v54, %v4392_v26  ;;  %v2055_v26 = vmul.f32 %v3362_v21, %v4523_v14  ;;  %v1769_v28 = vpop.f32.mrf.mxu3 }
 0x277   : > { %3367 = vrcp.f32 %v1993_v47  ;;  %v1898_v41 = vsub.f32 0.0, %v1768_v22  ;;  %v2104_v42 = vpack.c.bf16 %v2084_v46, %v2082_v51 }
 0x278   : > { %v1868_v49 = vadd.f32 %v1867_v63, %v1819_v62  ;;  %3369 = vrcp.f32 %v1990_v38  ;;  %v2087_v57 = vadd.f32 %v2055_v26, %v4353_v33 }
 0x279   : > { %v3364_v61 = vpop.eup %3363  ;;  %v1958_v60 = vmul.f32 1.442695, %v1898_v41  ;;  %2275 = vmatmul.bf16.gmra.mxu2 %v2104_v42 }
 0x27a   : > { %v1901_v23 = vsub.f32 0.0, %v1868_v49  ;;  %v1992_v2 = vadd.f32 1.0, %v3364_v61  ;;  %v1720_v19 = vpop.f32.mrf.mxu2 }
 0x27b   : > { %3371 = vpow2.f32 %v1958_v60  ;;  %v1721_v0 = vadd.f32 %v1720_v19, %v4397_v43 }
 0x27c   : > { %v3366_v4 = vpop.eup %3365  ;;  %v1964_v8 = vmul.f32 1.442695, %v1901_v23  ;;  %3373 = vrcp.f32 %v1992_v2 }
 0x27d   : > { %v3368_v48 = vpop.eup %3367  ;;  %v1770_v11 = vadd.f32 %v1769_v28, %v1721_v0  ;;  %v1995_v1 = vadd.f32 1.0, %v3366_v4 }
 0x27e   : > { %v2057_v55 = vmul.f32 %v3368_v48, %v4537_v25  ;;  %3375 = vpow2.f32 %v1964_v8  ;;  %v3370_v52 = vpop.eup %3369 }
 0x27f   : > { %v1900_v15 = vsub.f32 0.0, %v1770_v11  ;;  %v2054_v14 = vmul.f32 %v3370_v52, %v4531_v34  ;;  %3377 = vrcp.f32 %v1995_v1 }
 0x280   : > { %v2089_v53 = vadd.f32 %v2057_v55, %v4356_v12 }
 0x281   : > { %v3372_v35 = vpop.eup %3371  ;;  %v1962_v50 = vmul.f32 1.442695, %v1900_v15  ;;  %v2086_v10 = vadd.f32 %v2054_v14, %v4363_v20 }
 0x282   : > { %v2107_v24 = vpack.c.bf16 %v2089_v53, %v2087_v57  ;;  %v3374_v43 = vpop.eup %3373  ;;  %v1994_v25 = vadd.f32 1.0, %v3372_v35 }
 0x283   : > { %v2056_v29 = vmul.f32 %v3374_v43, %v4543_v27  ;;  %3379 = vpow2.f32 %v1962_v50 }
 0x284   : > { %v3376_v31 = vpop.eup %3375  ;;  %2329 = vmatmul.bf16.gmra.mxu3 %v2107_v24 }
 0x285   : > { %v1997_v32 = vadd.f32 1.0, %v3376_v31  ;;  %v2088_v33 = vadd.f32 %v2056_v29, %v4366_v56  ;;  %v3378_v9 = vpop.eup %3377 }
 0x286   : > { %v2059_v18 = vmul.f32 %v3378_v9, %v4547_v30 }
 0x287   : > { %3381 = vrcp.f32 %v1997_v32  ;;  %v2106_v12 = vpack.c.bf16 %v2088_v33, %v2086_v10 }
 0x288   : > { %3383 = vrcp.f32 %v1994_v25  ;;  %v2091_v45 = vadd.f32 %v2059_v18, %v4373_v13 }
 0x289   : > { %v3380_v34 = vpop.eup %3379  ;;  %2280 = vmatmul.bf16.gmra.mxu2 %v2106_v12 }
 0x28a   : > { %v1996_v7 = vadd.f32 1.0, %v3380_v34 }
 0x28c   : > { %3385 = vrcp.f32 %v1996_v7 }
 0x28d   : > { %v3382_v17 = vpop.eup %3381 }
 0x28e   : > { %v2061_v27 = vmul.f32 %v3382_v17, %v1868_v49  ;;  %v3384_v16 = vpop.eup %3383 }
 0x28f   : > { %v2058_v40 = vmul.f32 %v3384_v16, %v1768_v22 }
 0x290   : > { %v2093_v20 = vadd.f32 %v2061_v27, %v4376_v5 }
 0x291   : > { %v2090_v37 = vadd.f32 %v2058_v40, %v4382_v3 }
 0x292   : > { %v2109_v56 = vpack.c.bf16 %v2093_v20, %v2091_v45  ;;  %v3386_v58 = vpop.eup %3385 }
 0x293   : > { %v2060_v59 = vmul.f32 %v3386_v58, %v1770_v11 }
 0x294   : > { %2334 = vmatmul.bf16.gmra.mxu3 %v2109_v56 }
 0x295   : > { %v2092_v36 = vadd.f32 %v2060_v59, %v4385_v44 }
 0x297   : > { %v2108_v39 = vpack.c.bf16 %v2092_v36, %v2090_v37 }
 0x299   : > { %2285 = vmatmul.bf16.gmra.mxu2 %v2108_v39 }
 0x2a6   : > { %v2300_v30 = vpop.f32.mrf.mxu3 }
 0x2ac   : > { %v2251_v13 = vpop.f32.mrf.mxu2 }
 0x2ad   : > { %v2252_v5 = vadd.f32 %v4575_v6, %v2251_v13 }
 0x2ae   : > { %v2302_v3 = vpop.f32.mrf.mxu3 }
 0x2af   : > { %v2301_v44 = vadd.f32 %v2300_v30, %v2252_v5 }
 0x2b1   : > { %2340 = vst [vmem:[%s4582_s28] sm:$0xff] %v2301_v44 }
 0x2b4   : > { %v2253_v38 = vpop.f32.mrf.mxu2 }
 0x2b5   : > { %v2254_v47 = vadd.f32 %v4575_v6, %v2253_v38 }
 0x2b6   : > { %v2305_v54 = vpop.f32.mrf.mxu3 }
 0x2b7   : > { %v2303_v22 = vadd.f32 %v2302_v3, %v2254_v47 }
 0x2b9   : > { %2341 = vst [vmem:[%s4582_s28 + $0x8] sm:$0xff] %v2303_v22 }
 0x2bc   : > { %v2256_v62 = vpop.f32.mrf.mxu2 }
 0x2bd   : > { %v2257_v63 = vadd.f32 %v4575_v6, %v2256_v62 }
 0x2be   : > { %v2307_v51 = vpop.f32.mrf.mxu3 }
 0x2bf   : > { %v2306_v46 = vadd.f32 %v2305_v54, %v2257_v63 }
 0x2c1   : > { %2342 = vst [vmem:[%s4582_s28 + $0x10] sm:$0xff] %v2306_v46 }
 0x2c4   : > { %v2258_v41 = vpop.f32.mrf.mxu2 }
 0x2c5   : > { %v2259_v49 = vadd.f32 %v4575_v6, %v2258_v41 }
 0x2c7   : > { %v2310_v21 = vpop.f32.mrf.mxu3  ;;  %v2308_v42 = vadd.f32 %v2307_v51, %v2259_v49 }
 0x2c9   : > { %2343 = vst [vmem:[%s4582_s28 + $0x18] sm:$0xff] %v2308_v42 }
 0x2cc   : > { %v2261_v61 = vpop.f32.mrf.mxu2 }
 0x2cd   : > { %v2262_v60 = vadd.f32 %v4575_v6, %v2261_v61 }
 0x2cf   : > { %v2312_v23 = vpop.f32.mrf.mxu3  ;;  %v2311_v2 = vadd.f32 %v2310_v21, %v2262_v60 }
 0x2d1   : > { %2344 = vst [vmem:[%s4582_s28 + $0x20] sm:$0xff] %v2311_v2 }
 0x2d4   : > { %v2263_v19 = vpop.f32.mrf.mxu2 }
 0x2d5   : > { %v2264_v4 = vadd.f32 %v4575_v6, %v2263_v19 }
 0x2d7   : > { %v2315_v26 = vpop.f32.mrf.mxu3  ;;  %v2313_v8 = vadd.f32 %v2312_v23, %v2264_v4 }
 0x2d9   : > { %2345 = vst [vmem:[%s4582_s28 + $0x28] sm:$0xff] %v2313_v8 }
 0x2dc   : > { %v2266_v0 = vpop.f32.mrf.mxu2 }
 0x2dd   : > { %v2267_v48 = vadd.f32 %v4575_v6, %v2266_v0 }
 0x2df   : > { %v2317_v28 = vpop.f32.mrf.mxu3  ;;  %v2316_v55 = vadd.f32 %v2315_v26, %v2267_v48 }
 0x2e1   : > { %2346 = vst [vmem:[%s4582_s28 + $0x30] sm:$0xff] %v2316_v55 }
 0x2e4   : > { %v2268_v11 = vpop.f32.mrf.mxu2 }
 0x2e5   : > { %v2269_v52 = vadd.f32 %v4575_v6, %v2268_v11 }
 0x2e7   : > { %v2320_v1 = vpop.f32.mrf.mxu3  ;;  %v2318_v15 = vadd.f32 %v2317_v28, %v2269_v52 }
 0x2e9   : > { %2347 = vst [vmem:[%s4582_s28 + $0x38] sm:$0xff] %v2318_v15 }
 0x2ec   : > { %v2271_v57 = vpop.f32.mrf.mxu2 }
 0x2ed   : > { %v2272_v53 = vadd.f32 %v4575_v6, %v2271_v57 }
 0x2ef   : > { %v2322_v35 = vpop.f32.mrf.mxu3  ;;  %v2321_v14 = vadd.f32 %v2320_v1, %v2272_v53 }
 0x2f1   : > { %2348 = vst [vmem:[%s4582_s28 + $0x40] sm:$0xff] %v2321_v14 }
 0x2f4   : > { %v2273_v50 = vpop.f32.mrf.mxu2 }
 0x2f5   : > { %v2274_v24 = vadd.f32 %v4575_v6, %v2273_v50 }
 0x2f7   : > { %v2325_v43 = vpop.f32.mrf.mxu3  ;;  %v2323_v31 = vadd.f32 %v2322_v35, %v2274_v24 }
 0x2f9   : > { %2349 = vst [vmem:[%s4582_s28 + $0x48] sm:$0xff] %v2323_v31 }
 0x2fc   : > { %v2276_v29 = vpop.f32.mrf.mxu2 }
 0x2fd   : > { %v2277_v25 = vadd.f32 %v4575_v6, %v2276_v29 }
 0x2ff   : > { %v2327_v32 = vpop.f32.mrf.mxu3  ;;  %v2326_v10 = vadd.f32 %v2325_v43, %v2277_v25 }
 0x301   : > { %2350 = vst [vmem:[%s4582_s28 + $0x50] sm:$0xff] %v2326_v10 }
 0x304   : > { %v2278_v33 = vpop.f32.mrf.mxu2 }
 0x305   : > { %v2279_v12 = vadd.f32 %v4575_v6, %v2278_v33 }
 0x307   : > { %v2328_v9 = vadd.f32 %v2327_v32, %v2279_v12  ;;  %v2330_v34 = vpop.f32.mrf.mxu3 }
 0x309   : > { %2351 = vst [vmem:[%s4582_s28 + $0x58] sm:$0xff] %v2328_v9 }
 0x30c   : > { %v2281_v7 = vpop.f32.mrf.mxu2 }
 0x30d   : > { %v2282_v18 = vadd.f32 %v4575_v6, %v2281_v7 }
 0x30f   : > { %v2331_v17 = vadd.f32 %v2330_v34, %v2282_v18  ;;  %v2332_v27 = vpop.f32.mrf.mxu3 }
 0x311   : > { %2352 = vst [vmem:[%s4582_s28 + $0x60] sm:$0xff] %v2331_v17 }
 0x314   : > { %v2283_v16 = vpop.f32.mrf.mxu2 }
 0x315   : > { %v2284_v45 = vadd.f32 %v4575_v6, %v2283_v16 }
 0x317   : > { %v2333_v20 = vadd.f32 %v2332_v27, %v2284_v45  ;;  %v2335_v40 = vpop.f32.mrf.mxu3 }
 0x319   : > { %2353 = vst [vmem:[%s4582_s28 + $0x68] sm:$0xff] %v2333_v20 }
 0x31c   : > { %v2286_v56 = vpop.f32.mrf.mxu2 }
 0x31d   : > { %v2287_v58 = vadd.f32 %v4575_v6, %v2286_v56 }
 0x31f   : > { %v2336_v59 = vadd.f32 %v2335_v40, %v2287_v58  ;;  %v2337_v39 = vpop.f32.mrf.mxu3 }
 0x321   : > { %2354 = vst [vmem:[%s4582_s28 + $0x70] sm:$0xff] %v2336_v59 }
 0x324   : > { %v2288_v37 = vpop.f32.mrf.mxu2 }
 0x325   : > { %v2289_v36 = vadd.f32 %v4575_v6, %v2288_v37 }
 0x327   : > { %v2338_v30 = vadd.f32 %v2337_v39, %v2289_v36 }
 0x329   : > { %2355 = vst [vmem:[%s4582_s28 + $0x78] sm:$0xff] %v2338_v30 }
 0x32a PF: > { %s21_s30 = sadd.s32 1, %s3461_s30  }
 0x32b   : > { %p18_p7 = scmp.ge.s32.totalorder %s21_s30, 4  }
 0x32d   :  { %20 = sbr.rel (!%p18_p7) target bundleno = 2 (0x2), region = 95 }
 0x332   :  { %2378 = vsyncpa [#allocation3], 1 }
 0x333   :  { %2380 = vsyncpa [#allocation3 + $0x1], 1 }
 0x334   :  { %2381 = vsyncpa [#allocation5], 1 }

</bundles_post_ra>
